<compile_context>
chip_gen: v6e
topology: v6e:2x2x1
jax: 0.10.0
libtpu: 0.0.40
codegen_flags: <defaults>
</compile_context>

<pallas_src>
import functools

import numpy as np
import jax
import jax.numpy as jnp
from jax.experimental import pallas as pl
from jax.experimental.pallas import tpu as pltpu

jax.config.update("jax_default_matmul_precision", "highest")


def _round_up(x, m):
    return ((x + m - 1) // m) * m


class Node:
    def __init__(self, left=None, right=None):
        self.left = left
        self.right = right
        self.prediction = None


# ---------------------------------------------------------------------------
# Fused kernel: the whole tree traversal in one pallas_call.
# ---------------------------------------------------------------------------

def _decoder_kernel(child_dst_ref,                       # SMEM scalar prefetch
                    z_ref, wz_ref, bz_ref,               # z2h
                    wo_ref, bo_ref,                      # h2o (O padded to 128)
                    wig_ref, big_ref, whg_ref, bhg_ref,  # fused GRU gates
                    pred_ref,                            # output block
                    frontier_ref,                        # VMEM scratch (2*max_width, tile_r, H)
                    *, hidden, out_feat, gate_pad, max_width, tile_r):
    H, O, GP = hidden, out_feat, gate_pad
    l = pl.program_id(1)
    rows = max_width * tile_r

    # Level 0: fused z2h -> root hidden; zero the frontier so padded node
    # slots always hold finite values.
    @pl.when(l == 0)
    def _():
        frontier_ref[...] = jnp.zeros_like(frontier_ref)
        h0 = jnp.dot(z_ref[...], wz_ref[...],
                     preferred_element_type=jnp.float32) + bz_ref[...]
        frontier_ref[0] = h0                              # root: slot 0, pos 0

    cur = l % 2
    h3 = frontier_ref[pl.ds(cur * max_width, max_width), :, :]   # (max_width, tile_r, H)
    h2 = h3.reshape(rows, H)

    # h2o prediction; O is zero-padded to a full 128-lane slab -> unmasked,
    # lane-dense store of the whole block.
    pred = (jnp.dot(h2, wo_ref[...], preferred_element_type=jnp.float32)
            + bo_ref[...])
    pred_ref[...] = pred.reshape(1, max_width, tile_r, pred.shape[-1])

    # The GRU step is only needed if there is a deeper level.
    @pl.when(l + 1 < pl.num_programs(1))
    def _():
        # Softmax over the first O (valid) columns only.
        col = jax.lax.broadcasted_iota(jnp.int32, pred.shape, 1)
        valid = col < O
        m = jnp.max(jnp.where(valid, pred, -jnp.inf), axis=-1, keepdims=True)
        e = jnp.where(valid, jnp.exp(pred - m), 0.0)
        probs = e / jnp.sum(e, axis=-1, keepdims=True)

        # Fused GRU122 gates: two wide dots; each gate slab is 128-aligned.
        gi = (jnp.dot(probs, wig_ref[...], preferred_element_type=jnp.float32)
              + big_ref[...])
        gh = (jnp.dot(h2, whg_ref[...], preferred_element_type=jnp.float32)
              + bhg_ref[...])
        r = jax.nn.sigmoid(gi[:, 0:GP] + gh[:, 0:GP])
        zg = jax.nn.sigmoid(gi[:, GP:2 * GP] + gh[:, GP:2 * GP])
        n = jnp.tanh(gi[:, 2 * GP:3 * GP] + r * gh[:, 2 * GP:3 * GP])

        hh = jnp.concatenate([h2, h2], axis=-1)           # h.repeat(1, 1, 2)
        if GP > 2 * H:
            hh = jnp.concatenate(
                [hh, jnp.zeros((rows, GP - 2 * H), jnp.float32)], axis=-1)
        out = (1.0 - zg) * n + zg * hh                    # cols [0:H]=left, [H:2H]=right
        out3 = out.reshape(max_width, tile_r, GP)

        # Scatter child hidden states into the NEXT level's frontier slot.
        nxt = (l + 1) % 2
        for p in range(max_width):
            for s in range(2):                            # 0 = left, 1 = right
                d = child_dst_ref[(l * max_width + p) * 2 + s]
                child_h = out3[p, :, s * H:(s + 1) * H]

                @pl.when(d >= 0)
                def _store(child_h=child_h, d=d):
                    frontier_ref[nxt * max_width + d, :, :] = child_h


# ---------------------------------------------------------------------------
# Host-side wrapper: static tree metadata -> one fused pallas_call.
# ---------------------------------------------------------------------------

def _bfs_levels(tree):
    levels, frontier = [], [tree]
    while frontier:
        levels.append(frontier)
        nxt = []
        for node in frontier:
            if node.left is not None:
                nxt.append(node.left)
            if node.right is not None:
                nxt.append(node.right)
        frontier = nxt
    return levels


def decoder_forward(z, tree, params):
    """z: (B, S, input_size) f32.  Mutates `tree`, setting .prediction per node."""
    B, S, In = z.shape
    H = params["hidden_size"]
    O = params["output_size"]
    O_pad = params["h2o_w"].shape[1]
    GP = params["whg_w"].shape[1] // 3

    levels = _bfs_levels(tree)
    n_levels = len(levels)
    max_width = max(len(lv) for lv in levels)

    # Row tiling: pad B*S rows to a sublane multiple; when rows are plentiful
    # use 256-row tiles so v7x gets >= 2 parallel row tiles across its 2 TCs.
    R0 = B * S
    if R0 <= 512:
        R0_pad = _round_up(R0, 8)
        tile_r = R0_pad
    else:
        R0_pad = _round_up(R0, 512)
        tile_r = 256
    num_row_tiles = R0_pad // tile_r

    z2 = z.reshape(R0, In).astype(jnp.float32)
    if R0_pad != R0:
        z2 = jnp.concatenate(
            [z2, jnp.zeros((R0_pad - R0, In), jnp.float32)], axis=0)

    # Static child-destination table: [level, parent_pos, side] -> child slot
    # in the next level's frontier, or -1.  Flattened 1-D for compact SMEM.
    child_dst = np.full((n_levels, max_width, 2), -1, dtype=np.int32)
    for lvl in range(n_levels - 1):
        q = 0
        for p, node in enumerate(levels[lvl]):
            if node.left is not None:
                child_dst[lvl, p, 0] = q
                q += 1
            if node.right is not None:
                child_dst[lvl, p, 1] = q
                q += 1
    child_dst_flat = jnp.asarray(child_dst.reshape(-1))

    kernel = functools.partial(
        _decoder_kernel, hidden=H, out_feat=O, gate_pad=GP,
        max_width=max_width, tile_r=tile_r)

    def _const(arr):
        return pl.BlockSpec(arr.shape, lambda i, l, cd: (0, 0))

    grid_spec = pltpu.PrefetchScalarGridSpec(
        num_scalar_prefetch=1,
        grid=(num_row_tiles, n_levels),
        in_specs=[
            pl.BlockSpec((tile_r, In), lambda i, l, cd: (i, 0)),   # z rows
            _const(params["z2h_w"]), _const(params["z2h_b"]),
            _const(params["h2o_w"]), _const(params["h2o_b"]),
            _const(params["wig_w"]), _const(params["wig_b"]),
            _const(params["whg_w"]), _const(params["whg_b"]),
        ],
        out_specs=pl.BlockSpec((1, max_width, tile_r, O_pad),
                               lambda i, l, cd: (l, 0, i, 0)),
        scratch_shapes=[pltpu.VMEM((2 * max_width, tile_r, H), jnp.float32)],
    )

    pred4 = pl.pallas_call(
        kernel,
        grid_spec=grid_spec,
        out_shape=jax.ShapeDtypeStruct(
            (n_levels, max_width, R0_pad, O_pad), jnp.float32),
        compiler_params=pltpu.CompilerParams(
            dimension_semantics=("parallel", "arbitrary"),
            vmem_limit_bytes=32 * 1024 * 1024),
    )(child_dst_flat, z2,
      params["z2h_w"], params["z2h_b"],
      params["h2o_w"], params["h2o_b"],
      params["wig_w"], params["wig_b"],
      params["whg_w"], params["whg_b"])

    # Host-side: assign each node its prediction (valid rows / columns only).
    for lvl, lv in enumerate(levels):
        for p, node in enumerate(lv):
            node.prediction = pred4[lvl, p, :R0, :O].reshape(B, S, O)
    return tree


# ---------------------------------------------------------------------------
# Parameter init (xavier-uniform weights, torch-style biases) with the fused,
# lane-padded layouts the kernel expects.  Raw (unfused) tensors are returned
# too so a pure-JAX reference can be evaluated.
# ---------------------------------------------------------------------------

def init_params(key, input_size, hidden_size, output_size):
    In, H, O = input_size, hidden_size, output_size
    H2 = 2 * H
    GP = _round_up(H2, 128)       # 128-aligned gate slab
    O_pad = _round_up(O, 128)     # lane-dense prediction slab

    keys = jax.random.split(key, 16)

    def xavier(k, fi, fo):
        b = (6.0 / (fi + fo)) ** 0.5
        return jax.random.uniform(k, (fi, fo), jnp.float32, -b, b)

    def lin_bias(k, fi, fo):
        b = 1.0 / (fi ** 0.5)
        return jax.random.uniform(k, (fo,), jnp.float32, -b, b)

    raw = {
        "z2h_w": xavier(keys[0], In, H),  "z2h_b": lin_bias(keys[1], In, H),
        "h2o_w": xavier(keys[2], H, O),   "h2o_b": lin_bias(keys[3], H, O),
        "wir_w": xavier(keys[4], O, H2),  "wir_b": lin_bias(keys[5], O, H2),
        "whr_w": xavier(keys[6], H, H2),  "whr_b": lin_bias(keys[7], H, H2),
        "wiz_w": xavier(keys[8], O, H2),  "wiz_b": lin_bias(keys[9], O, H2),
        "whz_w": xavier(keys[10], H, H2), "whz_b": lin_bias(keys[11], H, H2),
        "win_w": xavier(keys[12], O, H2), "win_b": lin_bias(keys[13], O, H2),
        "whn_w": xavier(keys[14], H, H2), "whn_b": lin_bias(keys[15], H, H2),
    }

    # h2o padded to O_pad lanes (extra columns are exact zeros; softmax masks them).
    wo = jnp.zeros((H, O_pad), jnp.float32).at[:, :O].set(raw["h2o_w"])
    bo = jnp.zeros((1, O_pad), jnp.float32).at[0, :O].set(raw["h2o_b"])

    # Fused gate weights [ r | z | n ], each slab GP wide (first 2H cols valid).
    wig = jnp.zeros((O_pad, 3 * GP), jnp.float32)
    whg = jnp.zeros((H, 3 * GP), jnp.float32)
    big = jnp.zeros((1, 3 * GP), jnp.float32)
    bhg = jnp.zeros((1, 3 * GP), jnp.float32)
    for g, (iname, hname) in enumerate([("wir", "whr"), ("wiz", "whz"), ("win", "whn")]):
        c0 = g * GP
        wig = wig.at[:O, c0:c0 + H2].set(raw[iname + "_w"])
        whg = whg.at[:, c0:c0 + H2].set(raw[hname + "_w"])
        if g < 2:   # r, z: fold h-side bias into i-side bias (sigmoid(gi+gh))
            big = big.at[0, c0:c0 + H2].set(raw[iname + "_b"] + raw[hname + "_b"])
        else:       # n: h-side bias stays separate (multiplied by r)
            big = big.at[0, c0:c0 + H2].set(raw[iname + "_b"])
            bhg = bhg.at[0, c0:c0 + H2].set(raw[hname + "_b"])

    params = {
        "hidden_size": H, "output_size": O,
        "z2h_w": raw["z2h_w"], "z2h_b": raw["z2h_b"].reshape(1, H),
        "h2o_w": wo, "h2o_b": bo,
        "wig_w": wig, "wig_b": big,
        "whg_w": whg, "whg_b": bhg,
    }
    return params, raw


# ---------------------------------------------------------------------------
# Pure-JAX reference (mirrors the PyTorch Decoder.forward, depth-first).
# ---------------------------------------------------------------------------

def reference_forward(z, tree, raw):
    H = raw["z2h_w"].shape[1]

    def gru(x, h):
        r = jax.nn.sigmoid(x @ raw["wir_w"] + raw["wir_b"]
                           + h @ raw["whr_w"] + raw["whr_b"])
        zg = jax.nn.sigmoid(x @ raw["wiz_w"] + raw["wiz_b"]
                            + h @ raw["whz_w"] + raw["whz_b"])
        n = jnp.tanh(x @ raw["win_w"] + raw["win_b"]
                     + r * (h @ raw["whn_w"] + raw["whn_b"]))
        dh = jnp.concatenate([h, h], axis=-1)
        out = (1.0 - zg) * n + zg * dh
        return out[..., :H], out[..., H:]

    preds = []

    def rec(hidden, node):
        pred = hidden @ raw["h2o_w"] + raw["h2o_b"]
        preds.append(pred)
        probs = jax.nn.softmax(pred, axis=-1)
        if node.left is not None or node.right is not None:
            left, right = gru(probs, hidden)
            if node.left is not None:
                rec(left, node.left)
            if node.right is not None:
                rec(right, node.right)

    rec(z @ raw["z2h_w"] + raw["z2h_b"], tree)
    return preds


# ---------------------------------------------------------------------------
# Main
# ---------------------------------------------------------------------------

if __name__ == "__main__":
    INPUT_SIZE, HIDDEN_SIZE, OUTPUT_SIZE = 8, 32, 16
    B, S = 2, 1

    key = jax.random.PRNGKey(0)
    kz, kp = jax.random.split(key)
    z = jax.random.normal(kz, (B, S, INPUT_SIZE), jnp.float32)
    params, raw = init_params(kp, INPUT_SIZE, HIDDEN_SIZE, OUTPUT_SIZE)

    # small expression tree:   root -> (left -> (leaf, None), right leaf)
    tree = Node(left=Node(left=Node(), right=None), right=Node())

    decoder_forward(z, tree, params)

    def _collect(node, acc):
        if node is None:
            return
        if node.prediction is not None:
            acc.append(node.prediction)
        _collect(node.left, acc)
        _collect(node.right, acc)

    preds = []
    _collect(tree, preds)
    assert len(preds) == 4  # root, root.left, root.left.left, root.right

    refs = reference_forward(z, tree, raw)  # same (preorder) node order
    assert len(refs) == len(preds)
    for p, r in zip(preds, refs):
        jax.block_until_ready(p)
        assert p.shape == (B, S, OUTPUT_SIZE)
        assert bool(jnp.all(jnp.isfinite(p)))
        assert bool(jnp.allclose(p, r, atol=5e-3, rtol=5e-3)), \
            float(jnp.max(jnp.abs(p - r)))

    print("KERNEL_OK")
</pallas_src>

<mosaic_0001>
module attributes {stable_mosaic.version = 11 : i64} {
  func.func @_decoder_kernel(%arg0: i32, %arg1: i32, %arg2: memref<12xi32, #tpu.memory_space<smem>>, %arg3: memref<8x8xf32, #tpu.memory_space<vmem>>, %arg4: memref<8x32xf32, #tpu.memory_space<vmem>>, %arg5: memref<1x32xf32, #tpu.memory_space<vmem>>, %arg6: memref<32x128xf32, #tpu.memory_space<vmem>>, %arg7: memref<1x128xf32, #tpu.memory_space<vmem>>, %arg8: memref<128x384xf32, #tpu.memory_space<vmem>>, %arg9: memref<1x384xf32, #tpu.memory_space<vmem>>, %arg10: memref<32x384xf32, #tpu.memory_space<vmem>>, %arg11: memref<1x384xf32, #tpu.memory_space<vmem>>, %arg12: memref<1x2x8x128xf32, #tpu.memory_space<vmem>>, %arg13: memref<4x8x32xf32, #tpu.memory_space<vmem>>) attributes {dimension_semantics = [#tpu.dimension_semantics<parallel>, #tpu.dimension_semantics<arbitrary>], iteration_bounds = array<i64: 1, 3>, scalar_prefetch = 1 : i64, scratch_operands = 1 : i64, tpu.core_type = #tpu.core_type<tc>, window_params = [{transform_indices = @transform_0, window_bounds = array<i64: 8, 8>}, {pipeline_mode = #tpu.pipeline_mode<synchronous>, transform_indices = @transform_1, window_bounds = array<i64: 8, 32>}, {pipeline_mode = #tpu.pipeline_mode<synchronous>, transform_indices = @transform_2, window_bounds = array<i64: 1, 32>}, {pipeline_mode = #tpu.pipeline_mode<synchronous>, transform_indices = @transform_3, window_bounds = array<i64: 32, 128>}, {pipeline_mode = #tpu.pipeline_mode<synchronous>, transform_indices = @transform_4, window_bounds = array<i64: 1, 128>}, {pipeline_mode = #tpu.pipeline_mode<synchronous>, transform_indices = @transform_5, window_bounds = array<i64: 128, 384>}, {pipeline_mode = #tpu.pipeline_mode<synchronous>, transform_indices = @transform_6, window_bounds = array<i64: 1, 384>}, {pipeline_mode = #tpu.pipeline_mode<synchronous>, transform_indices = @transform_7, window_bounds = array<i64: 32, 384>}, {pipeline_mode = #tpu.pipeline_mode<synchronous>, transform_indices = @transform_8, window_bounds = array<i64: 1, 384>}, {transform_indices = @transform_9, window_bounds = array<i64: 1, 2, 8, 128>}]} {
    %c0_i32 = arith.constant 0 : i32
    %0 = arith.cmpi eq, %arg1, %c0_i32 : i32
    %1 = arith.extui %0 : i1 to i32
    %c0_i32_0 = arith.constant 0 : i32
    %2 = arith.cmpi ne, %1, %c0_i32_0 : i32
    scf.if %2 {
      %cst_17 = arith.constant 0.000000e+00 : f32
      %28 = vector.broadcast %cst_17 : f32 to vector<4x8x32xf32>
      %c0_18 = arith.constant 0 : index
      %c0_19 = arith.constant 0 : index
      %c0_20 = arith.constant 0 : index
      %29 = vector.load %arg13[%c0_18, %c0_19, %c0_20] : memref<4x8x32xf32, #tpu.memory_space<vmem>>, vector<4x8x32xf32>
      tpu.vector_store %arg13[%c0_18, %c0_19, %c0_20], %28 {strides = array<i32>} : memref<4x8x32xf32, #tpu.memory_space<vmem>>, vector<4x8x32xf32>,
      %c0_21 = arith.constant 0 : index
      %c0_22 = arith.constant 0 : index
      %30 = vector.load %arg3[%c0_21, %c0_22] : memref<8x8xf32, #tpu.memory_space<vmem>>, vector<8x8xf32>
      %c0_23 = arith.constant 0 : index
      %c0_24 = arith.constant 0 : index
      %31 = vector.load %arg4[%c0_23, %c0_24] : memref<8x32xf32, #tpu.memory_space<vmem>>, vector<8x32xf32>
      %cst_25 = arith.constant dense<0.000000e+00> : vector<8x32xf32>
      %32 = tpu.matmul %30, %31, %cst_25 {dimension_numbers = #tpu.dot_dimension_numbers<[1], [0], [0], [1], [0, 0, 1, 1], [], []>, precision = #tpu.contract_precision<fp32>} : vector<8x8xf32>, vector<8x32xf32>, vector<8x32xf32> -> vector<8x32xf32>
      %c0_26 = arith.constant 0 : index
      %c0_27 = arith.constant 0 : index
      %33 = vector.load %arg5[%c0_26, %c0_27] : memref<1x32xf32, #tpu.memory_space<vmem>>, vector<1x32xf32>
      %34 = vector.broadcast %33 : vector<1x32xf32> to vector<8x32xf32>
      %35 = arith.addf %32, %34 : vector<8x32xf32>
      %c0_28 = arith.constant 0 : index
      %c0_29 = arith.constant 0 : index
      %c0_30 = arith.constant 0 : index
      %36 = vector.load %arg13[%c0_28, %c0_29, %c0_30] : memref<4x8x32xf32, #tpu.memory_space<vmem>>, vector<1x8x32xf32>
      %37 = vector.shape_cast %36 : vector<1x8x32xf32> to vector<8x32xf32>
      %38 = vector.shape_cast %35 : vector<8x32xf32> to vector<1x8x32xf32>
      tpu.vector_store %arg13[%c0_28, %c0_29, %c0_30], %38 {strides = array<i32>} : memref<4x8x32xf32, #tpu.memory_space<vmem>>, vector<1x8x32xf32>,
    } else {
    }
    %c2_i32 = arith.constant 2 : i32
    %c0_i32_1 = arith.constant 0 : i32
    %3 = arith.cmpi eq, %c2_i32, %c0_i32_1 : i32
    %c1_i32 = arith.constant 1 : i32
    %4 = arith.select %3, %c1_i32, %c2_i32 : i32
    %5 = arith.remsi %arg1, %4 : i32
    %c0_i32_2 = arith.constant 0 : i32
    %6 = arith.cmpi ne, %5, %c0_i32_2 : i32
    %c0_i32_3 = arith.constant 0 : i32
    %7 = arith.cmpi slt, %5, %c0_i32_3 : i32
    %c0_i32_4 = arith.constant 0 : i32
    %8 = arith.cmpi slt, %4, %c0_i32_4 : i32
    %9 = arith.xori %7, %8 : i1
    %10 = arith.andi %9, %6 : i1
    %11 = arith.addi %5, %4 : i32
    %12 = arith.select %10, %11, %5 : i32
    %c2_i32_5 = arith.constant 2 : i32
    %13 = arith.muli %12, %c2_i32_5 : i32
    %14 = arith.index_cast %13 : i32 to index
    %c0 = arith.constant 0 : index
    %c0_6 = arith.constant 0 : index
    %15 = vector.load %arg13[%14, %c0, %c0_6] : memref<4x8x32xf32, #tpu.memory_space<vmem>>, vector<2x8x32xf32>
    %16 = vector.shape_cast %15 : vector<2x8x32xf32> to vector<16x32xf32>
    %c0_7 = arith.constant 0 : index
    %c0_8 = arith.constant 0 : index
    %17 = vector.load %arg6[%c0_7, %c0_8] : memref<32x128xf32, #tpu.memory_space<vmem>>, vector<32x128xf32>
    %cst = arith.constant dense<0.000000e+00> : vector<16x128xf32>
    %18 = tpu.matmul %16, %17, %cst {dimension_numbers = #tpu.dot_dimension_numbers<[1], [0], [0], [1], [0, 0, 1, 1], [], []>, precision = #tpu.contract_precision<fp32>} : vector<16x32xf32>, vector<32x128xf32>, vector<16x128xf32> -> vector<16x128xf32>
    %c0_9 = arith.constant 0 : index
    %c0_10 = arith.constant 0 : index
    %19 = vector.load %arg7[%c0_9, %c0_10] : memref<1x128xf32, #tpu.memory_space<vmem>>, vector<1x128xf32>
    %20 = vector.broadcast %19 : vector<1x128xf32> to vector<16x128xf32>
    %21 = arith.addf %18, %20 : vector<16x128xf32>
    %22 = vector.shape_cast %21 : vector<16x128xf32> to vector<1x2x8x128xf32>
    %c0_11 = arith.constant 0 : index
    %c0_12 = arith.constant 0 : index
    %c0_13 = arith.constant 0 : index
    %c0_14 = arith.constant 0 : index
    %23 = vector.load %arg12[%c0_11, %c0_12, %c0_13, %c0_14] : memref<1x2x8x128xf32, #tpu.memory_space<vmem>>, vector<1x2x8x128xf32>
    tpu.vector_store %arg12[%c0_11, %c0_12, %c0_13, %c0_14], %22 {strides = array<i32>} : memref<1x2x8x128xf32, #tpu.memory_space<vmem>>, vector<1x2x8x128xf32>,
    %c1_i32_15 = arith.constant 1 : i32
    %24 = arith.addi %arg1, %c1_i32_15 : i32
    %c3_i32 = arith.constant 3 : i32
    %25 = arith.cmpi slt, %24, %c3_i32 : i32
    %26 = arith.extui %25 : i1 to i32
    %c0_i32_16 = arith.constant 0 : i32
    %27 = arith.cmpi ne, %26, %c0_i32_16 : i32
    scf.if %27 {
      %28 = tpu.iota {dimensions = array<i32: 1>} : vector<16x128xi32>
      %c16_i32 = arith.constant 16 : i32
      %29 = vector.broadcast %c16_i32 : i32 to vector<16x128xi32>
      %30 = arith.cmpi slt, %28, %29 : vector<16x128xi32>
      %cst_17 = arith.constant 0xFF800000 : f32
      %31 = vector.broadcast %cst_17 : f32 to vector<16x128xf32>
      %32 = arith.select %30, %21, %31 : vector<16x128xi1>, vector<16x128xf32>
      %cst_18 = arith.constant dense<0xFF800000> : vector<16xf32>
      %33 = vector.multi_reduction <maximumf>, %32, %cst_18 [1] : vector<16x128xf32> to vector<16xf32>
      %34 = vector.shape_cast %33 : vector<16xf32> to vector<16x1xf32>
      %35 = vector.broadcast %34 : vector<16x1xf32> to vector<16x128xf32>
      %36 = arith.subf %21, %35 : vector<16x128xf32>
      %37 = math.exp %36 : vector<16x128xf32>
      %cst_19 = arith.constant 0.000000e+00 : f32
      %38 = vector.broadcast %cst_19 : f32 to vector<16x128xf32>
      %39 = arith.select %30, %37, %38 : vector<16x128xi1>, vector<16x128xf32>
      %cst_20 = arith.constant dense<0.000000e+00> : vector<16xf32>
      %40 = vector.multi_reduction <add>, %39, %cst_20 [1] : vector<16x128xf32> to vector<16xf32>
      %41 = vector.shape_cast %40 : vector<16xf32> to vector<16x1xf32>
      %42 = vector.broadcast %41 : vector<16x1xf32> to vector<16x128xf32>
      %43 = arith.divf %39, %42 : vector<16x128xf32>
      %c0_21 = arith.constant 0 : index
      %c0_22 = arith.constant 0 : index
      %44 = vector.load %arg8[%c0_21, %c0_22] : memref<128x384xf32, #tpu.memory_space<vmem>>, vector<128x384xf32>
      %cst_23 = arith.constant dense<0.000000e+00> : vector<16x384xf32>
      %45 = tpu.matmul %43, %44, %cst_23 {dimension_numbers = #tpu.dot_dimension_numbers<[1], [0], [0], [1], [0, 0, 1, 1], [], []>, precision = #tpu.contract_precision<fp32>} : vector<16x128xf32>, vector<128x384xf32>, vector<16x384xf32> -> vector<16x384xf32>
      %c0_24 = arith.constant 0 : index
      %c0_25 = arith.constant 0 : index
      %46 = vector.load %arg9[%c0_24, %c0_25] : memref<1x384xf32, #tpu.memory_space<vmem>>, vector<1x384xf32>
      %47 = vector.broadcast %46 : vector<1x384xf32> to vector<16x384xf32>
      %48 = arith.addf %45, %47 : vector<16x384xf32>
      %c0_26 = arith.constant 0 : index
      %c0_27 = arith.constant 0 : index
      %49 = vector.load %arg10[%c0_26, %c0_27] : memref<32x384xf32, #tpu.memory_space<vmem>>, vector<32x384xf32>
      %cst_28 = arith.constant dense<0.000000e+00> : vector<16x384xf32>
      %50 = tpu.matmul %16, %49, %cst_28 {dimension_numbers = #tpu.dot_dimension_numbers<[1], [0], [0], [1], [0, 0, 1, 1], [], []>, precision = #tpu.contract_precision<fp32>} : vector<16x32xf32>, vector<32x384xf32>, vector<16x384xf32> -> vector<16x384xf32>
      %c0_29 = arith.constant 0 : index
      %c0_30 = arith.constant 0 : index
      %51 = vector.load %arg11[%c0_29, %c0_30] : memref<1x384xf32, #tpu.memory_space<vmem>>, vector<1x384xf32>
      %52 = vector.broadcast %51 : vector<1x384xf32> to vector<16x384xf32>
      %53 = arith.addf %50, %52 : vector<16x384xf32>
      %54 = vector.extract_strided_slice %48 {offsets = [0, 0], sizes = [16, 128], strides = [1, 1]} : vector<16x384xf32> to vector<16x128xf32>
      %55 = vector.extract_strided_slice %53 {offsets = [0, 0], sizes = [16, 128], strides = [1, 1]} : vector<16x384xf32> to vector<16x128xf32>
      %56 = arith.addf %54, %55 : vector<16x128xf32>
      %57 = arith.negf %56 : vector<16x128xf32>
      %58 = math.exp %57 : vector<16x128xf32>
      %cst_31 = arith.constant 1.000000e+00 : f32
      %59 = vector.broadcast %cst_31 : f32 to vector<16x128xf32>
      %60 = arith.addf %59, %58 : vector<16x128xf32>
      %61 = arith.divf %59, %60 : vector<16x128xf32>
      %62 = vector.extract_strided_slice %48 {offsets = [0, 128], sizes = [16, 128], strides = [1, 1]} : vector<16x384xf32> to vector<16x128xf32>
      %63 = vector.extract_strided_slice %53 {offsets = [0, 128], sizes = [16, 128], strides = [1, 1]} : vector<16x384xf32> to vector<16x128xf32>
      %64 = arith.addf %62, %63 : vector<16x128xf32>
      %65 = arith.negf %64 : vector<16x128xf32>
      %66 = math.exp %65 : vector<16x128xf32>
      %cst_32 = arith.constant 1.000000e+00 : f32
      %67 = vector.broadcast %cst_32 : f32 to vector<16x128xf32>
      %68 = arith.addf %67, %66 : vector<16x128xf32>
      %69 = arith.divf %67, %68 : vector<16x128xf32>
      %70 = vector.extract_strided_slice %48 {offsets = [0, 256], sizes = [16, 128], strides = [1, 1]} : vector<16x384xf32> to vector<16x128xf32>
      %71 = vector.extract_strided_slice %53 {offsets = [0, 256], sizes = [16, 128], strides = [1, 1]} : vector<16x384xf32> to vector<16x128xf32>
      %72 = arith.mulf %61, %71 : vector<16x128xf32>
      %73 = arith.addf %70, %72 : vector<16x128xf32>
      %74 = math.tanh %73 : vector<16x128xf32>
      %75 = tpu.concatenate %16, %16 in 1 : vector<16x32xf32>, vector<16x32xf32> -> vector<16x64xf32>
      %cst_33 = arith.constant 0.000000e+00 : f32
      %76 = vector.broadcast %cst_33 : f32 to vector<16x64xf32>
      %77 = tpu.concatenate %75, %76 in 1 : vector<16x64xf32>, vector<16x64xf32> -> vector<16x128xf32>
      %cst_34 = arith.constant 1.000000e+00 : f32
      %78 = vector.broadcast %cst_34 : f32 to vector<16x128xf32>
      %79 = arith.subf %78, %69 : vector<16x128xf32>
      %80 = arith.mulf %79, %74 : vector<16x128xf32>
      %81 = arith.mulf %69, %77 : vector<16x128xf32>
      %82 = arith.addf %80, %81 : vector<16x128xf32>
      %83 = vector.shape_cast %82 : vector<16x128xf32> to vector<2x8x128xf32>
      %c1_i32_35 = arith.constant 1 : i32
      %84 = arith.addi %arg1, %c1_i32_35 : i32
      %c2_i32_36 = arith.constant 2 : i32
      %c0_i32_37 = arith.constant 0 : i32
      %85 = arith.cmpi eq, %c2_i32_36, %c0_i32_37 : i32
      %c1_i32_38 = arith.constant 1 : i32
      %86 = arith.select %85, %c1_i32_38, %c2_i32_36 : i32
      %87 = arith.remsi %84, %86 : i32
      %c0_i32_39 = arith.constant 0 : i32
      %88 = arith.cmpi ne, %87, %c0_i32_39 : i32
      %c0_i32_40 = arith.constant 0 : i32
      %89 = arith.cmpi slt, %87, %c0_i32_40 : i32
      %c0_i32_41 = arith.constant 0 : i32
      %90 = arith.cmpi slt, %86, %c0_i32_41 : i32
      %91 = arith.xori %89, %90 : i1
      %92 = arith.andi %91, %88 : i1
      %93 = arith.addi %87, %86 : i32
      %94 = arith.select %92, %93, %87 : i32
      %c2_i32_42 = arith.constant 2 : i32
      %95 = arith.muli %arg1, %c2_i32_42 : i32
      %c0_i32_43 = arith.constant 0 : i32
      %96 = arith.addi %95, %c0_i32_43 : i32
      %c2_i32_44 = arith.constant 2 : i32
      %97 = arith.muli %96, %c2_i32_44 : i32
      %c0_i32_45 = arith.constant 0 : i32
      %98 = arith.addi %97, %c0_i32_45 : i32
      %99 = arith.index_cast %98 : i32 to index
      %100 = memref.load %arg2[%99] : memref<12xi32, #tpu.memory_space<smem>>
      %101 = vector.extract_strided_slice %83 {offsets = [0, 0, 0], sizes = [1, 8, 32], strides = [1, 1, 1]} : vector<2x8x128xf32> to vector<1x8x32xf32>
      %102 = vector.shape_cast %101 : vector<1x8x32xf32> to vector<8x32xf32>
      %c0_i32_46 = arith.constant 0 : i32
      %103 = arith.cmpi sge, %100, %c0_i32_46 : i32
      %104 = arith.extui %103 : i1 to i32
      %c0_i32_47 = arith.constant 0 : i32
      %105 = arith.cmpi ne, %104, %c0_i32_47 : i32
      scf.if %105 {
        %c2_i32_66 = arith.constant 2 : i32
        %139 = arith.muli %94, %c2_i32_66 : i32
        %140 = arith.addi %139, %100 : i32
        %141 = arith.index_cast %140 : i32 to index
        %c0_67 = arith.constant 0 : index
        %c0_68 = arith.constant 0 : index
        %142 = vector.load %arg13[%141, %c0_67, %c0_68] : memref<4x8x32xf32, #tpu.memory_space<vmem>>, vector<1x8x32xf32>
        %143 = vector.shape_cast %142 : vector<1x8x32xf32> to vector<8x32xf32>
        %144 = vector.shape_cast %102 : vector<8x32xf32> to vector<1x8x32xf32>
        tpu.vector_store %arg13[%141, %c0_67, %c0_68], %144 {strides = array<i32>} : memref<4x8x32xf32, #tpu.memory_space<vmem>>, vector<1x8x32xf32>,
      } else {
      }
      %c2_i32_48 = arith.constant 2 : i32
      %106 = arith.muli %arg1, %c2_i32_48 : i32
      %c0_i32_49 = arith.constant 0 : i32
      %107 = arith.addi %106, %c0_i32_49 : i32
      %c2_i32_50 = arith.constant 2 : i32
      %108 = arith.muli %107, %c2_i32_50 : i32
      %c1_i32_51 = arith.constant 1 : i32
      %109 = arith.addi %108, %c1_i32_51 : i32
      %110 = arith.index_cast %109 : i32 to index
      %111 = memref.load %arg2[%110] : memref<12xi32, #tpu.memory_space<smem>>
      %112 = vector.extract_strided_slice %83 {offsets = [0, 0, 32], sizes = [1, 8, 32], strides = [1, 1, 1]} : vector<2x8x128xf32> to vector<1x8x32xf32>
      %113 = vector.shape_cast %112 : vector<1x8x32xf32> to vector<8x32xf32>
      %c0_i32_52 = arith.constant 0 : i32
      %114 = arith.cmpi sge, %111, %c0_i32_52 : i32
      %115 = arith.extui %114 : i1 to i32
      %c0_i32_53 = arith.constant 0 : i32
      %116 = arith.cmpi ne, %115, %c0_i32_53 : i32
      scf.if %116 {
        %c2_i32_66 = arith.constant 2 : i32
        %139 = arith.muli %94, %c2_i32_66 : i32
        %140 = arith.addi %139, %111 : i32
        %141 = arith.index_cast %140 : i32 to index
        %c0_67 = arith.constant 0 : index
        %c0_68 = arith.constant 0 : index
        %142 = vector.load %arg13[%141, %c0_67, %c0_68] : memref<4x8x32xf32, #tpu.memory_space<vmem>>, vector<1x8x32xf32>
        %143 = vector.shape_cast %142 : vector<1x8x32xf32> to vector<8x32xf32>
        %144 = vector.shape_cast %113 : vector<8x32xf32> to vector<1x8x32xf32>
        tpu.vector_store %arg13[%141, %c0_67, %c0_68], %144 {strides = array<i32>} : memref<4x8x32xf32, #tpu.memory_space<vmem>>, vector<1x8x32xf32>,
      } else {
      }
      %c2_i32_54 = arith.constant 2 : i32
      %117 = arith.muli %arg1, %c2_i32_54 : i32
      %c1_i32_55 = arith.constant 1 : i32
      %118 = arith.addi %117, %c1_i32_55 : i32
      %c2_i32_56 = arith.constant 2 : i32
      %119 = arith.muli %118, %c2_i32_56 : i32
      %c0_i32_57 = arith.constant 0 : i32
      %120 = arith.addi %119, %c0_i32_57 : i32
      %121 = arith.index_cast %120 : i32 to index
      %122 = memref.load %arg2[%121] : memref<12xi32, #tpu.memory_space<smem>>
      %123 = vector.extract_strided_slice %83 {offsets = [1, 0, 0], sizes = [1, 8, 32], strides = [1, 1, 1]} : vector<2x8x128xf32> to vector<1x8x32xf32>
      %124 = vector.shape_cast %123 : vector<1x8x32xf32> to vector<8x32xf32>
      %c0_i32_58 = arith.constant 0 : i32
      %125 = arith.cmpi sge, %122, %c0_i32_58 : i32
      %126 = arith.extui %125 : i1 to i32
      %c0_i32_59 = arith.constant 0 : i32
      %127 = arith.cmpi ne, %126, %c0_i32_59 : i32
      scf.if %127 {
        %c2_i32_66 = arith.constant 2 : i32
        %139 = arith.muli %94, %c2_i32_66 : i32
        %140 = arith.addi %139, %122 : i32
        %141 = arith.index_cast %140 : i32 to index
        %c0_67 = arith.constant 0 : index
        %c0_68 = arith.constant 0 : index
        %142 = vector.load %arg13[%141, %c0_67, %c0_68] : memref<4x8x32xf32, #tpu.memory_space<vmem>>, vector<1x8x32xf32>
        %143 = vector.shape_cast %142 : vector<1x8x32xf32> to vector<8x32xf32>
        %144 = vector.shape_cast %124 : vector<8x32xf32> to vector<1x8x32xf32>
        tpu.vector_store %arg13[%141, %c0_67, %c0_68], %144 {strides = array<i32>} : memref<4x8x32xf32, #tpu.memory_space<vmem>>, vector<1x8x32xf32>,
      } else {
      }
      %c2_i32_60 = arith.constant 2 : i32
      %128 = arith.muli %arg1, %c2_i32_60 : i32
      %c1_i32_61 = arith.constant 1 : i32
      %129 = arith.addi %128, %c1_i32_61 : i32
      %c2_i32_62 = arith.constant 2 : i32
      %130 = arith.muli %129, %c2_i32_62 : i32
      %c1_i32_63 = arith.constant 1 : i32
      %131 = arith.addi %130, %c1_i32_63 : i32
      %132 = arith.index_cast %131 : i32 to index
      %133 = memref.load %arg2[%132] : memref<12xi32, #tpu.memory_space<smem>>
      %134 = vector.extract_strided_slice %83 {offsets = [1, 0, 32], sizes = [1, 8, 32], strides = [1, 1, 1]} : vector<2x8x128xf32> to vector<1x8x32xf32>
      %135 = vector.shape_cast %134 : vector<1x8x32xf32> to vector<8x32xf32>
      %c0_i32_64 = arith.constant 0 : i32
      %136 = arith.cmpi sge, %133, %c0_i32_64 : i32
      %137 = arith.extui %136 : i1 to i32
      %c0_i32_65 = arith.constant 0 : i32
      %138 = arith.cmpi ne, %137, %c0_i32_65 : i32
      scf.if %138 {
        %c2_i32_66 = arith.constant 2 : i32
        %139 = arith.muli %94, %c2_i32_66 : i32
        %140 = arith.addi %139, %133 : i32
        %141 = arith.index_cast %140 : i32 to index
        %c0_67 = arith.constant 0 : index
        %c0_68 = arith.constant 0 : index
        %142 = vector.load %arg13[%141, %c0_67, %c0_68] : memref<4x8x32xf32, #tpu.memory_space<vmem>>, vector<1x8x32xf32>
        %143 = vector.shape_cast %142 : vector<1x8x32xf32> to vector<8x32xf32>
        %144 = vector.shape_cast %135 : vector<8x32xf32> to vector<1x8x32xf32>
        tpu.vector_store %arg13[%141, %c0_67, %c0_68], %144 {strides = array<i32>} : memref<4x8x32xf32, #tpu.memory_space<vmem>>, vector<1x8x32xf32>,
      } else {
      }
    } else {
    }
    return
  }
  func.func @transform_0(%arg0: i32, %arg1: i32, %arg2: memref<12xi32, #tpu.memory_space<smem>>) -> (i32, i32) {
    %c0_i32 = arith.constant 0 : i32
    %c0_i32_0 = arith.constant 0 : i32
    return %arg0, %c0_i32 : i32, i32
  }
  func.func @transform_1(%arg0: i32, %arg1: i32, %arg2: memref<12xi32, #tpu.memory_space<smem>>) -> (i32, i32) {
    %c0_i32 = arith.constant 0 : i32
    %c0_i32_0 = arith.constant 0 : i32
    %c0_i32_1 = arith.constant 0 : i32
    return %c0_i32, %c0_i32_0 : i32, i32
  }
  func.func @transform_2(%arg0: i32, %arg1: i32, %arg2: memref<12xi32, #tpu.memory_space<smem>>) -> (i32, i32) {
    %c0_i32 = arith.constant 0 : i32
    %c0_i32_0 = arith.constant 0 : i32
    %c0_i32_1 = arith.constant 0 : i32
    return %c0_i32, %c0_i32_0 : i32, i32
  }
  func.func @transform_3(%arg0: i32, %arg1: i32, %arg2: memref<12xi32, #tpu.memory_space<smem>>) -> (i32, i32) {
    %c0_i32 = arith.constant 0 : i32
    %c0_i32_0 = arith.constant 0 : i32
    %c0_i32_1 = arith.constant 0 : i32
    return %c0_i32, %c0_i32_0 : i32, i32
  }
  func.func @transform_4(%arg0: i32, %arg1: i32, %arg2: memref<12xi32, #tpu.memory_space<smem>>) -> (i32, i32) {
    %c0_i32 = arith.constant 0 : i32
    %c0_i32_0 = arith.constant 0 : i32
    %c0_i32_1 = arith.constant 0 : i32
    return %c0_i32, %c0_i32_0 : i32, i32
  }
  func.func @transform_5(%arg0: i32, %arg1: i32, %arg2: memref<12xi32, #tpu.memory_space<smem>>) -> (i32, i32) {
    %c0_i32 = arith.constant 0 : i32
    %c0_i32_0 = arith.constant 0 : i32
    %c0_i32_1 = arith.constant 0 : i32
    return %c0_i32, %c0_i32_0 : i32, i32
  }
  func.func @transform_6(%arg0: i32, %arg1: i32, %arg2: memref<12xi32, #tpu.memory_space<smem>>) -> (i32, i32) {
    %c0_i32 = arith.constant 0 : i32
    %c0_i32_0 = arith.constant 0 : i32
    %c0_i32_1 = arith.constant 0 : i32
    return %c0_i32, %c0_i32_0 : i32, i32
  }
  func.func @transform_7(%arg0: i32, %arg1: i32, %arg2: memref<12xi32, #tpu.memory_space<smem>>) -> (i32, i32) {
    %c0_i32 = arith.constant 0 : i32
    %c0_i32_0 = arith.constant 0 : i32
    %c0_i32_1 = arith.constant 0 : i32
    return %c0_i32, %c0_i32_0 : i32, i32
  }
  func.func @transform_8(%arg0: i32, %arg1: i32, %arg2: memref<12xi32, #tpu.memory_space<smem>>) -> (i32, i32) {
    %c0_i32 = arith.constant 0 : i32
    %c0_i32_0 = arith.constant 0 : i32
    %c0_i32_1 = arith.constant 0 : i32
    return %c0_i32, %c0_i32_0 : i32, i32
  }
  func.func @transform_9(%arg0: i32, %arg1: i32, %arg2: memref<12xi32, #tpu.memory_space<smem>>) -> (i32, i32, i32, i32) {
    %c0_i32 = arith.constant 0 : i32
    %c0_i32_0 = arith.constant 0 : i32
    %c0_i32_1 = arith.constant 0 : i32
    return %arg1, %c0_i32, %arg0, %c0_i32_0 : i32, i32, i32, i32
  }
}

</mosaic_0001>

<bundles_post_ra>
// kernel: tpu_custom_call.1
= control target key start
LH: loop header
LB: loop body
LE: loop exit
PB: predicated region body
PF: predicated region fallthrough
CT: control target
= control target key end

     0   :  { %s5533_s13 = smov [#allocation4]   ;;  %s7220_s0 = inlined_call_operand.hbm [shape: s32[12], index: 0, kind: input, shape index: {}]   ;;  %s7221_s1 = inlined_call_operand.hbm [shape: f32[8,8], index: 1, kind: input, shape index: {}]   ;;  %s7222_s2 = inlined_call_operand.hbm [shape: f32[8,32], index: 2, kind: input, shape index: {}]   ;;  %s7223_s3 = inlined_call_operand.vmem [shape: f32[1,32], index: 3, kind: input, shape index: {}]   ;;  %s7224_s4 = inlined_call_operand.hbm [shape: f32[32,128], index: 4, kind: input, shape index: {}]   ;;  %s7225_s5 = inlined_call_operand.vmem [shape: f32[1,128], index: 5, kind: input, shape index: {}]   ;;  %s7226_s6 = inlined_call_operand.hbm [shape: f32[128,384], index: 6, kind: input, shape index: {}]   ;;  %s7227_s7 = inlined_call_operand.vmem [shape: f32[1,384], index: 7, kind: input, shape index: {}]   ;;  %s7228_s8 = inlined_call_operand.hbm [shape: f32[32,384], index: 8, kind: input, shape index: {}]   ;;  %s7229_s9 = inlined_call_operand.vmem [shape: f32[1,384], index: 9, kind: input, shape index: {}]   ;;  %s7230_s10 = inlined_call_operand.hbm [shape: f32[3,2,8,128], index: 10, kind: output, shape index: {}]  }
   0x1   :  { %7329 = sst [smem:[#allocation54_spill]] %s7222_s2 }
   0x2   :  { %16 = dma.hbm_to_smem %s7220_s0, 16, %s5533_s13, [#allocation3] }
   0x3   :  { %5491 = dma.done.wait [#allocation3], 16 }
   0x4   :  { %5492 = vsyncadd [#allocation3], 4294967280 }
   0x5   :  { %18 = sfence }
   0x6   :  { %19 = vsyncpa [#allocation6], 0 }
   0x7   :  { %20 = vsyncpa [#allocation9], 0 }
   0x8   :  { %21 = vsyncpa [#allocation12], 0 }
   0x9   :  { %22 = vsyncpa [#allocation7], 0 }
   0xa   :  { %24 = vsyncpa [#allocation7 + $0x1], 0  ;;  %s5610_s16 = smov 0   ;;  %s5612_s17 = smov 0  }
   0xb   :  { %s5614_s18 = smov 0   ;;  %s5616_s19 = smov 0  }
   0xc   :  { %s5618_s20 = smov 0   ;;  %s5620_s21 = smov 0  }
   0xd LB: > { %7330 = sst [smem:[#allocation20_spill]] %s5527_s20  ;;  %s4536_s0 = sadd.s32 4294967295, %s5531_s21   ;;  %s5531_s21 = sphi %s5620_s21, %s30_s21   ;;  %s5527_s20 = sphi %s5618_s20, %s7458_s20   ;;  %s5523_s19 = sphi %s5616_s19, %s7462_s19   ;;  %s5519_s18 = sphi %s5614_s18, %s7461_s18   ;;  %s5515_s17 = sphi %s5612_s17, %s7460_s17   ;;  %s5511_s16 = sphi %s5610_s16, %s7459_s16  }
   0xe   : > { %s4537_s22 = sadd.s32 4294967294, %s5531_s21   ;;  %s39_s23 = sadd.s32 1, %s5527_s20 }
   0xf   : > { %s245_s24 = sadd.s32 1, %s5519_s18  ;;  %p40_p0 = scmp.ge.s32.totalorder %s39_s23, 3 }
  0x10   : > { %p255_p1 = scmp.ne.s32.totalorder %s5519_s18, %s5515_s17  ;;  %p256_p2 = scmp.eq.s32.totalorder %s4536_s0, 2 }
  0x11   : > { %p261_p3 = scmp.ne.s32.totalorder %s5515_s17, %s5511_s16  ;;  %s7464_s23 = smov (%p40_p0, %s39_s23), 0 }
  0x12   : > { %7331 = sst [smem:[#allocation21_spill]] %s7464_s23  ;;  %p5650_p4 = por %p256_p2, %p255_p1 }
  0x13   : > { %p262_p5 = scmp.eq.s32.totalorder %s4537_s22, 2  ;;  %s240_s26 = ssub.s32 %s5527_s20, %s7464_s23 }
  0x14   : > { %s7332_s25 = scalar_select %p5650_p4, 1, 0 }
  0x15   : > { %p4538_p6 = scmp.ge.s32.totalorder %s5531_s21, 1  ;;  %p243_p7 = scmp.eq.s32.totalorder %s240_s26, 0 }
  0x16   : > { %p5657_p8 = por %p262_p5, %p261_p3  ;;  %p269_p9 = scmp.lt.s32.totalorder %s5531_s21, 4 }
  0x17   : > { %s5663_s28 = scalar_select %p243_p7, %s5519_s18, %s245_s24  }
  0x18   : > { %s7333_s27 = scalar_select %p5657_p8, 1, 0 }
  0x19   : > { %7334 = sst [smem:[#allocation22_spill]] %s5663_s28  ;;  %p5665_p10 = pnand %p4538_p6, %p269_p9 }
  0x1a   : > { %p5669_p11 = scmp.eq.s32.totalorder %s4536_s0, 0  ;;  %s5534_s11 = smov [#allocation8]  }
  0x1b   : > { %s7335_s29 = scalar_select %p5665_p10, 1, 0 }
  0x1c   : > { %s7336_s30 = scalar_select %p5669_p11, 1, 0 }
  0x1d   : > { %p5178_p12 = pneg %p5665_p10  ;;  %s295_s12 = sshll.u32 %s5534_s11, 4  ;;  %s296_s12 = int_to_ptr.vmem [resolvable:$true] %s295_s12 }
  0x1e   : > { %s5535_s13 = smov [#allocation11]   ;;  %s5322_s22 = scalar_lea.vmem %s296_s12, 128 }
  0x1f   : > { %s324_s14 = sshll.u32 %s5535_s13, 4  ;;  %p5677_p13 = pnand %p5669_p11, %p5178_p12  ;;  %s325_s14 = int_to_ptr.vmem [resolvable:$true] %s324_s14 }
  0x20   : > { %p5323_p1 = scmp.ne.s32.totalorder %s296_s12, %s5322_s22  ;;  %p5330_p5 = scmp.lt.s32.totalorder %s296_s12, %s296_s12 }
  0x21   : > { %p5683_p0 = pneg %p5677_p13  ;;  %p5331_p6 = scmp.lt.s32.totalorder %s5322_s22, %s5322_s22 }
  0x23   : > { %p5325_p2 = pnand %p5323_p1, %p5683_p0  ;;  %p5332_p7 = por %p5331_p6, %p5330_p5 }
  0x25   : > { %p5326_p3 = pneg %p5325_p2 }
  0x27   : > { %p5333_p9 = pnand %p5332_p7, %p5326_p3 }
  0x29   : > { %5336 = shalt.err (!%p5333_p9)
}
  0x2a   : > { %s7339_s2 = sld [smem:[#allocation54_spill]]  ;;  %s5348_s11 = scalar_lea.vmem %s325_s14, 6144 }
  0x2b   : > { %p5349_p12 = scmp.ne.s32.totalorder %s325_s14, %s5348_s11  ;;  %p5356_p11 = scmp.lt.s32.totalorder %s325_s14, %s325_s14 }
  0x2c   : > { %p5357_p1 = scmp.lt.s32.totalorder %s5348_s11, %s5348_s11 }
  0x2d   : > { %p5351_p8 = pnand %p5349_p12, %p5683_p0 }
  0x2e   : > { %p5358_p2 = por %p5357_p1, %p5356_p11 }
  0x2f   : > { %p5352_p4 = pneg %p5351_p8 }
  0x30   : > { %5184 = dma.hbm_to_vmem [thread:$0]  (!%p5677_p13), %s7339_s2, 128, %s296_s12, [#allocation9]  }
  0x31   : > { %p5359_p10 = pnand %p5358_p2, %p5352_p4 }
  0x33   : > { %5362 = shalt.err (!%p5359_p10)
}
  0x34   : > { %s5536_s13 = smov 384   ;;  %s5537_s22 = smov 24  }
  0x35   : > { %5190 = dma.hbm_to_vmem [thread:$0]  (!%p5677_p13), %s7226_s6, 6144, %s325_s14, [#allocation12], %s5536_s13, %s5536_s13, %s5537_s22  }
  0x36   : > { %s5538_s26 = smov [#allocation5]   ;;  %s5539_s23 = smov [#allocation10]  }
  0x37   : > { %s284_s2 = sshll.u32 %s5538_s26, 4  ;;  %s308_s11 = sshll.u32 %s5539_s23, 4  ;;  %s285_s2 = int_to_ptr.vmem [resolvable:$true] %s284_s2  ;;  %s309_s11 = int_to_ptr.vmem [resolvable:$true] %s308_s11 }
  0x38   : > { %s5374_s20 = scalar_lea.vmem %s285_s2, 128  ;;  %p5382_p11 = scmp.lt.s32.totalorder %s285_s2, %s285_s2 }
  0x39   : > { %p5375_p4 = scmp.ne.s32.totalorder %s285_s2, %s5374_s20  ;;  %p5383_p3 = scmp.lt.s32.totalorder %s5374_s20, %s5374_s20 }
  0x3b   : > { %p5377_p8 = pnand %p5375_p4, %p5683_p0  ;;  %p5384_p5 = por %p5383_p3, %p5382_p11 }
  0x3d   : > { %p5378_p10 = pneg %p5377_p8 }
  0x3f   : > { %p5385_p6 = pnand %p5384_p5, %p5378_p10 }
  0x41   : > { %5388 = shalt.err (!%p5385_p6)
}
  0x42   : > { %5181 = dma.hbm_to_vmem [thread:$0]  (!%p5677_p13), %s7221_s1, 128, %s285_s2, [#allocation6]  }
  0x43   : > { %s5400_s14 = scalar_lea.vmem %s309_s11, 512  ;;  %p5408_p1 = scmp.lt.s32.totalorder %s309_s11, %s309_s11 }
  0x44   : > { %p5401_p7 = scmp.ne.s32.totalorder %s309_s11, %s5400_s14  ;;  %p5409_p2 = scmp.lt.s32.totalorder %s5400_s14, %s5400_s14 }
  0x46   : > { %p5403_p9 = pnand %p5401_p7, %p5683_p0  ;;  %p5410_p4 = por %p5409_p2, %p5408_p1 }
  0x48   : > { %p5404_p12 = pneg %p5403_p9 }
  0x4a   : > { %p5411_p8 = pnand %p5410_p4, %p5404_p12 }
  0x4c   : > { %5414 = shalt.err (!%p5411_p8)
}
  0x4d   : > { %s5540_s20 = smov 128   ;;  %s5541_s23 = smov 8  }
  0x4e   : > { %5187 = dma.hbm_to_vmem [thread:$0]  (!%p5677_p13), %s7224_s4, 512, %s309_s11, [#allocation9], %s5540_s20, %s5540_s20, %s5541_s23  }
  0x4f   : > { %s5542_s2 = smov [#allocation13]  }
  0x50   : > { %s340_s26 = sshll.u32 %s5542_s2, 4  ;;  %s341_s26 = int_to_ptr.vmem [resolvable:$true] %s340_s26 }
  0x51   : > { %s5426_s24 = scalar_lea.vmem %s341_s26, 1536  ;;  %p5434_p5 = scmp.lt.s32.totalorder %s341_s26, %s341_s26 }
  0x52   : > { %p5427_p10 = scmp.ne.s32.totalorder %s341_s26, %s5426_s24  ;;  %p5435_p6 = scmp.lt.s32.totalorder %s5426_s24, %s5426_s24 }
  0x54   : > { %p5429_p11 = pnand %p5427_p10, %p5683_p0  ;;  %p5436_p7 = por %p5435_p6, %p5434_p5 }
  0x56   : > { %p5430_p3 = pneg %p5429_p11 }
  0x58   : > { %p5437_p9 = pnand %p5436_p7, %p5430_p3 }
  0x5a   : > { %5440 = shalt.err (!%p5437_p9)
}
  0x5b   : > { %5193 = dma.hbm_to_vmem [thread:$0]  (!%p5677_p13), %s7228_s8, 1536, %s341_s26, [#allocation12], %s5536_s13, %s5536_s13, %s5537_s22  }
  0x5c   : > { %p7340_p12 = scmp.ne.s32.totalorder %s7335_s29, 0 }
  0x5e   : > { %359 = sbr.rel (%p7340_p12) target bundleno = 1658 (0x67a), region = 56 }
  0x63   : > { %p7341_p0 = scmp.ne.s32.totalorder %s7336_s30, 0 }
  0x65   : > { %5494 = dma.done.wait (%p7341_p0), [#allocation6], 128  }
  0x66   : > { %5496 = vsyncadd (%p7341_p0), [#allocation6], 4294967168 }
  0x67   : > { %5498 = dma.done.wait (%p7341_p0), [#allocation9], 640  }
  0x68   : > { %5500 = vsyncadd (%p7341_p0), [#allocation9], 4294966656 }
  0x69   : > { %5502 = dma.done.wait (%p7341_p0), [#allocation12], 7680  }
  0x6a   : > { %5504 = vsyncadd (%p7341_p0), [#allocation12], 4294959616  ;;  %s7328_s29 = sand.u32 1, %s5515_s17   ;;  %p4551_p13 = scmp.ne.s32.totalorder %s5523_s19, 0 }
  0x6b   : > { %s4550_s15 = sshll.u32 %s7328_s29, 4 }
  0x6c   : > { %s5745_s0 = scalar_lea.vmem [#allocation14], %s4550_s15  ;;  %409 = sbr.rel (%p4551_p13) target bundleno = 331 (0x14b), region = 80 }
  0x71   : > { %v416_v0 = vld [vmem:[#allocation8] sm:$0xff]  ;;  %v415_v1 = vld [vmem:[#allocation5] sm:$0xff]  ;;  %vm424_vm0 = vcmask 64512   ;;  %v5543_v2 = vmov 0.0   ;;  %vm5544_vm1 = vmmov 0   ;;  %vm410_vm2 = vcmask 261120  }
  0x72   : > { %4784 = vmatprep.subr.mxu0 %v5543_v2  ;;  %v459_v3 = vand.u32 4294901760, %v416_v0  ;;  %4789 = vmatprep.subr.mxu1 %v5543_v2  ;;  %v426_v4 = vsel %vm424_vm0, %v415_v1, 0  ;;  %411 = vst.msk [vmem:[#allocation2] sm:$0xff] %vm410_vm2, %v5543_v2  ;;  %412 = vst.msk [vmem:[#allocation2 + $0x8] sm:$0xff] %vm410_vm2, %v5543_v2  ;;  %v4552_v14 = vld [vmem:[%s7223_s3] ss:$0 sm:$0xff] }
  0x73   : > { %4786 = vmatprep.mubr.msk.f32.mxu0 %vm5544_vm1, %v5543_v2  ;;  %4791 = vmatprep.mubr.msk.f32.mxu1 %vm5544_vm1, %v5543_v2  ;;  %v494_v5 = vand.u32 4294901760, %v426_v4  ;;  %413 = vst.msk [vmem:[#allocation2 + $0x10] sm:$0xff] %vm410_vm2, %v5543_v2  ;;  %414 = vst.msk [vmem:[#allocation2 + $0x18] sm:$0xff] %vm410_vm2, %v5543_v2 }
  0x74   : > { %4785 = vmatpush3.msra.mxu0 %v459_v3  ;;  %v536_v6 = vsub.f32 %v416_v0, %v459_v3 }
  0x75   : > { %4794 = vmatprep.subr.mxu0 %v5543_v2  ;;  %v495_v7 = vsub.f32 %v426_v4, %v494_v5 }
  0x76   : > { %v537_v8 = vand.u32 4294901760, %v536_v6 }
  0x77   : > { %v496_v9 = vand.u32 4294901760, %v495_v7 }
  0x78   : > { %v538_v10 = vsub.f32 %v536_v6, %v537_v8 }
  0x79   : > { %v497_v11 = vsub.f32 %v495_v7, %v496_v9 }
  0x7a   : > { %v539_v12 = vand.u32 4294901760, %v538_v10 }
  0x7b   : > { %v498_v13 = vand.u32 4294901760, %v497_v11 }
  0x7c   : > { %4790 = vmatpush3.msra.mxu1 %v539_v12 }
  0x7d   : > { %4787 = vmatmul.mubr.f32.vlgmr.msra.gmra.mxu0 %v498_v13  ;;  %4792 = vmatmul.mubr.f32.vlgmr.msra.gmra.mxu1 %v494_v5 }
  0x7e   : > { %4795 = vmatpush3.msra.mxu0 %v536_v6  ;;  %4799 = vmatprep.subr.mxu1 %v5543_v2 }
  0x7f   : > { %4800 = vmatpush3.msra.mxu1 %v459_v3  ;;  %4796 = vmatprep.mubr.msk.f32.mxu0 %vm5544_vm1, %v5543_v2 }
  0x80   : > { %4801 = vmatprep.mubr.msk.f32.mxu1 %vm5544_vm1, %v5543_v2  ;;  %4804 = vmatprep.subr.mxu0 %v5543_v2 }
  0x81   : > { %4797 = vmatmul.mubr.f32.vlgmr.msra.gmra.mxu0 %v495_v7  ;;  %4802 = vmatmul.mubr.f32.vlgmr.msra.gmra.mxu1 %v496_v9 }
  0x82   : > { %4805 = vmatpush3.msra.mxu0 %v537_v8  ;;  %4809 = vmatprep.subr.mxu1 %v5543_v2 }
  0x83   : > { %4810 = vmatpush3.msra.mxu1 %v459_v3  ;;  %4806 = vmatprep.mubr.msk.f32.mxu0 %vm5544_vm1, %v5543_v2 }
  0x84   : > { %4811 = vmatprep.mubr.msk.f32.mxu1 %vm5544_vm1, %v5543_v2 }
  0x85   : > { %4807 = vmatmul.mubr.f32.vlgmr.msra.gmra.mxu0 %v494_v5  ;;  %4812 = vmatmul.mubr.f32.vlgmr.msra.gmra.mxu1 %v494_v5 }
 0x13d   : > { %v500_v15 = vpop.f32.mrf.mxu0  ;;  %v576_v16 = vpop.f32.mrf.mxu1 }
 0x13e   : > { %v501_v17 = vadd.f32 %v4552_v14, %v500_v15 }
 0x13f   : > { %v4788_v18 = vpop.f32.mrf.mxu0  ;;  %v4793_v19 = vpop.f32.mrf.mxu1 }
 0x140   : > { %v577_v20 = vadd.f32 %v576_v16, %v501_v17 }
 0x141   : > { %v650_v21 = vpop.f32.mrf.mxu0  ;;  %v724_v22 = vpop.f32.mrf.mxu1 }
 0x142   : > { %v651_v23 = vadd.f32 %v650_v21, %v577_v20 }
 0x143   : > { %v4798_v24 = vpop.f32.mrf.mxu0  ;;  %v4803_v25 = vpop.f32.mrf.mxu1 }
 0x144   : > { %v725_v26 = vadd.f32 %v724_v22, %v651_v23 }
 0x145   : > { %v798_v27 = vpop.f32.mrf.mxu0  ;;  %v870_v28 = vpop.f32.mrf.mxu1 }
 0x146   : > { %v799_v29 = vadd.f32 %v798_v27, %v725_v26 }
 0x147   : > { %v4808_v30 = vpop.f32.mrf.mxu0  ;;  %v4813_v31 = vpop.f32.mrf.mxu1 }
 0x148   : > { %v871_v32 = vadd.f32 %v870_v28, %v799_v29 }
 0x14a   : > { %874 = vst.msk [vmem:[#allocation2] sm:$0xff] %vm410_vm2, %v871_v32 }
 0x14b PF: > { %v895_v33 = vld [vmem:[#allocation10 + $0x18] sm:$0xff]  ;;  %v894_v34 = vld [vmem:[#allocation10 + $0x10] sm:$0xff]  ;;  %v893_v35 = vld [vmem:[#allocation10 + $0x8] sm:$0xff]  ;;  %p875_p1 = scmp.lt.s32.totalorder %s5523_s19, 0  ;;  %s876_s22 = ssub.s32 0, %s5523_s19  ;;  %vm903_vm3 = vcmask 261120  }
 0x14c   : > { %v5764_v36 = vand.u32 4294901760, %v895_v33  ;;  %v5766_v37 = vand.u32 4294901760, %v894_v34  ;;  %v5768_v38 = vand.u32 4294901760, %v893_v35  ;;  %v892_v39 = vld [vmem:[#allocation10] sm:$0xff]  ;;  %s4553_s20 = smin.u32 %s5523_s19, %s876_s22  ;;  %s5892_s24 = sadd.s32 1, %s5523_s19 }
 0x14d   : > { %v5771_v40 = vand.u32 4294901760, %v892_v39  ;;  %s878_s23 = sand.u32 1, %s4553_s20   ;;  %v4558_v8 = vld [vmem:[%s7225_s5] ss:$0 sm:$0xff]  ;;  %p4559_p4 = scmp.ge.s32.totalorder %s5892_s24, 3 }
 0x14e   : > { %4814 = vmatprep.subr.mxu0 %v5764_v36  ;;  %v5775_v41 = vsub.f32 %v895_v33, %v5764_v36  ;;  %v5778_v42 = vsub.f32 %v894_v34, %v5766_v37  ;;  %v5781_v43 = vsub.f32 %v893_v35, %v5768_v38  ;;  %s879_s12 = ssub.s32 0, %s878_s23 }
 0x14f   : > { %4815 = vmatpush3.msra.mxu0 %v5764_v36  ;;  %v5785_v44 = vsub.f32 %v892_v39, %v5771_v40  ;;  %s7466_s12 = smov (!%p875_p1, %s879_s12), %s878_s23 }
 0x150   : > { %v5790_v45 = vand.u32 4294901760, %v5775_v41  ;;  %4816 = vmatprep.subr.mxu0 %v5766_v37  ;;  %v5794_v46 = vand.u32 4294901760, %v5778_v42  ;;  %v5797_v47 = vand.u32 4294901760, %v5781_v43  ;;  %p4555_p2 = scmp.lt.s32.totalorder %s7466_s12, 0  ;;  %s885_s28 = sadd.s32 2, %s7466_s12 }
 0x151   : > { %4817 = vmatpush3.msra.mxu0 %v5766_v37  ;;  %v5801_v48 = vand.u32 4294901760, %v5785_v44 }
 0x152   : > { %v1027_v49 = vsub.f32 %v5775_v41, %v5790_v45  ;;  %v1034_v50 = vsub.f32 %v5778_v42, %v5794_v46  ;;  %4818 = vmatprep.subr.mxu0 %v5768_v38  ;;  %v1041_v51 = vsub.f32 %v5781_v43, %v5797_v47  ;;  %s7468_s28 = smov (!%p4555_p2, %s885_s28), %s7466_s12 }
 0x153   : > { %4819 = vmatpush3.msra.mxu0 %v5768_v38  ;;  %v1048_v54 = vsub.f32 %v5785_v44, %v5801_v48  ;;  %s4587_s2 = sshll.u32 %s7468_s28, 4 }
 0x154   : > { %v1028_v52 = vand.u32 4294901760, %v1027_v49  ;;  %v1035_v53 = vand.u32 4294901760, %v1034_v50  ;;  %4820 = vmatprep.subr.mxu0 %v5771_v40  ;;  %v1042_v55 = vand.u32 4294901760, %v1041_v51  ;;  %s889_s26 = scalar_lea.vmem [#allocation2], %s4587_s2 }
 0x155   : > { %4821 = vmatpush3.msra.mxu0 %v5771_v40  ;;  %v5816_v56 = vld [vmem:[%s889_s26] sm:$0xff]  ;;  %v5818_v57 = vld [vmem:[%s889_s26 + $0x8] sm:$0xff]  ;;  %v1049_v58 = vand.u32 4294901760, %v1048_v54 }
 0x156   : > { %4825 = vmatprep.subr.mxu1 %v1028_v52  ;;  %4836 = vmatprep.subr.mxu0 %v5775_v41  ;;  %7342 = vst [vmem:[#allocation23_spill] sm:$0xff] %v5816_v56  ;;  %7343 = vst [vmem:[#allocation24_spill] sm:$0xff] %v5818_v57  ;;  %v905_v59 = vsel %vm903_vm3, %v5816_v56, 0  ;;  %v908_v60 = vsel %vm903_vm3, %v5818_v57, 0 }
 0x157   : > { %4826 = vmatpush3.msra.mxu1 %v1028_v52  ;;  %v5824_v61 = vand.u32 4294901760, %v905_v59  ;;  %v5826_v62 = vand.u32 4294901760, %v908_v60 }
 0x158   : > { %4827 = vmatprep.subr.mxu1 %v1035_v53 }
 0x159   : > { %4828 = vmatpush3.msra.mxu1 %v1035_v53  ;;  %7344 = vst [vmem:[#allocation25_spill] sm:$0xff] %v5824_v61  ;;  %7345 = vst [vmem:[#allocation26_spill] sm:$0xff] %v5826_v62  ;;  %v5829_v63 = vsub.f32 %v905_v59, %v5824_v61  ;;  %4833 = vmatprep.mubr.f32.mxu1 %v5824_v61  ;;  %v5833_v0 = vsub.f32 %v908_v60, %v5826_v62 }
 0x15a   : > { %4829 = vmatprep.subr.mxu1 %v1042_v55 }
 0x15b   : > { %4830 = vmatpush3.msra.mxu1 %v1042_v55  ;;  %7346 = vst [vmem:[#allocation27_spill] sm:$0xff] %v5829_v63  ;;  %7347 = vst [vmem:[#allocation28_spill] sm:$0xff] %v5833_v0  ;;  %v5836_v1 = vand.u32 4294901760, %v5829_v63  ;;  %v5839_v2 = vand.u32 4294901760, %v5833_v0 }
 0x15c   : > { %4831 = vmatprep.subr.mxu1 %v1049_v58 }
 0x15d   : > { %4832 = vmatpush3.msra.mxu1 %v1049_v58  ;;  %7348 = vst [vmem:[#allocation29_spill] sm:$0xff] %v5836_v1  ;;  %7349 = vst [vmem:[#allocation30_spill] sm:$0xff] %v5839_v2  ;;  %v982_v3 = vsub.f32 %v5829_v63, %v5836_v1  ;;  %v992_v4 = vsub.f32 %v5833_v0, %v5839_v2 }
 0x15e   : > { %4847 = vmatprep.subr.mxu1 %v5764_v36  ;;  %4834 = vmatmul.mubr.f32.vlgmr.msra.gmra.mxu1 %v5826_v62 }
 0x15f   : > { %4848 = vmatpush3.msra.mxu1 %v5764_v36  ;;  %4855 = vmatprep.mubr.f32.mxu1 %v5836_v1  ;;  %v5850_v5 = vand.u32 4294901760, %v982_v3  ;;  %v5852_v6 = vand.u32 4294901760, %v992_v4 }
 0x160   : > { %4849 = vmatprep.subr.mxu1 %v5766_v37 }
 0x161   : > { %7350 = vst [vmem:[#allocation31_spill] sm:$0xff] %v5850_v5  ;;  %7351 = vst [vmem:[#allocation32_spill] sm:$0xff] %v5852_v6  ;;  %4850 = vmatpush3.msra.mxu1 %v5766_v37  ;;  %4822 = vmatprep.mubr.f32.mxu0 %v5850_v5 }
 0x162   : > { %4851 = vmatprep.subr.mxu1 %v5768_v38  ;;  %4823 = vmatmul.mubr.f32.vlgmr.msra.gmra.mxu0 %v5852_v6 }
 0x163   : > { %4852 = vmatpush3.msra.mxu1 %v5768_v38  ;;  %4837 = vmatpush3.msra.mxu0 %v5775_v41 }
 0x164   : > { %4853 = vmatprep.subr.mxu1 %v5771_v40  ;;  %4844 = vmatprep.mubr.f32.mxu0 %v5829_v63 }
 0x165   : > { %4838 = vmatprep.subr.mxu0 %v5778_v42  ;;  %4854 = vmatpush3.msra.mxu1 %v5771_v40 }
 0x166   : > { %4839 = vmatpush3.msra.mxu0 %v5778_v42  ;;  %4869 = vmatprep.subr.mxu1 %v5764_v36 }
 0x167   : > { %4840 = vmatprep.subr.mxu0 %v5781_v43  ;;  %4856 = vmatmul.mubr.f32.vlgmr.msra.gmra.mxu1 %v5839_v2 }
 0x168   : > { %4841 = vmatpush3.msra.mxu0 %v5781_v43  ;;  %4870 = vmatpush3.msra.mxu1 %v5764_v36 }
 0x169   : > { %4842 = vmatprep.subr.mxu0 %v5785_v44  ;;  %4871 = vmatprep.subr.mxu1 %v5766_v37 }
 0x16a   : > { %4843 = vmatpush3.msra.mxu0 %v5785_v44  ;;  %4872 = vmatpush3.msra.mxu1 %v5766_v37 }
 0x16b   : > { %4845 = vmatmul.mubr.f32.vlgmr.msra.gmra.mxu0 %v5833_v0  ;;  %4858 = vmatprep.subr.mxu0 %v5790_v45 }
 0x16c   : > { %4859 = vmatpush3.msra.mxu0 %v5790_v45  ;;  %4873 = vmatprep.subr.mxu1 %v5768_v38 }
 0x16d   : > { %4860 = vmatprep.subr.mxu0 %v5794_v46  ;;  %4874 = vmatpush3.msra.mxu1 %v5768_v38 }
 0x16e   : > { %4861 = vmatpush3.msra.mxu0 %v5794_v46  ;;  %4875 = vmatprep.subr.mxu1 %v5771_v40 }
 0x16f   : > { %4862 = vmatprep.subr.mxu0 %v5797_v47  ;;  %4866 = vmatprep.mubr.f32.mxu0 %v5824_v61 }
 0x170   : > { %4863 = vmatpush3.msra.mxu0 %v5797_v47  ;;  %4876 = vmatpush3.msra.mxu1 %v5771_v40 }
 0x171   : > { %4864 = vmatprep.subr.mxu0 %v5801_v48  ;;  %4877 = vmatprep.mubr.f32.mxu1 %v5824_v61 }
 0x172   : > { %4865 = vmatpush3.msra.mxu0 %v5801_v48  ;;  %4878 = vmatmul.mubr.f32.vlgmr.msra.gmra.mxu1 %v5826_v62 }
 0x173   : > { %4867 = vmatmul.mubr.f32.vlgmr.msra.gmra.mxu0 %v5826_v62 }
 0x21e   : > { %v4835_v9 = vpop.f32.mrf.mxu1 }
 0x220   : > { %v1086_v13 = vpop.f32.mrf.mxu1 }
 0x222   : > { %v4824_v7 = vpop.f32.mrf.mxu0 }
 0x223   : > { %v996_v11 = vadd.f32 %v4824_v7, %v4558_v8 }
 0x224   : > { %v985_v10 = vpop.f32.mrf.mxu0 }
 0x225   : > { %v986_v12 = vadd.f32 %v4558_v8, %v985_v10  ;;  %v1093_v15 = vadd.f32 %v4835_v9, %v996_v11 }
 0x227   : > { %v4857_v16 = vpop.f32.mrf.mxu1  ;;  %v1087_v18 = vadd.f32 %v1086_v13, %v986_v12 }
 0x229   : > { %v1256_v21 = vpop.f32.mrf.mxu1 }
 0x22b   : > { %v4846_v14 = vpop.f32.mrf.mxu0 }
 0x22c   : > { %v1180_v19 = vadd.f32 %v4846_v14, %v1093_v15 }
 0x22d   : > { %v1172_v17 = vpop.f32.mrf.mxu0 }
 0x22e   : > { %v1173_v20 = vadd.f32 %v1172_v17, %v1087_v18  ;;  %v1265_v22 = vadd.f32 %v4857_v16, %v1180_v19 }
 0x230   : > { %v1257_v25 = vadd.f32 %v1256_v21, %v1173_v20 }
 0x232   : > { %v4879_v24 = vpop.f32.mrf.mxu1 }
 0x233   : > { %v4868_v23 = vpop.f32.mrf.mxu0 }
 0x234   : > { %v1354_v26 = vadd.f32 %v4868_v23, %v1265_v22  ;;  %v1428_v30 = vpop.f32.mrf.mxu1 }
 0x235   : > { %v1347_v27 = vpop.f32.mrf.mxu0 }
 0x236   : > { %v5897_v28 = vadd.f32 %v4879_v24, %v1354_v26  ;;  %v1348_v29 = vadd.f32 %v1347_v27, %v1257_v25  ;;  %1444 = sbr.rel (%p4559_p4) target bundleno = 1632 (0x660), region = 84 }
 0x238   : > { %1439 = vst [vmem:[%s5745_s0 + $0x8] sm:$0xff] %v5897_v28  ;;  %v5901_v31 = vadd.f32 %v1428_v30, %v1348_v29 }
 0x23a   : > { %1438 = vst [vmem:[%s5745_s0] sm:$0xff] %v5901_v31 }
 0x23b   : > { %v7237_v32 = vlaneseq  ;;  %v1516_v36 = vld [vmem:[#allocation11 + $0x170] sm:$0xff]  ;;  %v1515_v37 = vld [vmem:[#allocation11 + $0x168] sm:$0xff]  ;;  %v1513_v38 = vld [vmem:[#allocation11 + $0x158] sm:$0xff]  ;;  %s5546_s15 = smov 32   ;;  %s4326_s30 = ssub.s32 0, %s5892_s24  ;;  %vm4314_vm5 = vcmask 523264  }
 0x23c   : > { %v5916_v39 = vand.u32 4294901760, %v1516_v36  ;;  %v5918_v40 = vand.u32 4294901760, %v1515_v37  ;;  %v5920_v41 = vand.u32 4294901760, %v1513_v38  ;;  %v1512_v42 = vld [vmem:[#allocation11 + $0x150] sm:$0xff]  ;;  %v1510_v43 = vld [vmem:[#allocation11 + $0x140] sm:$0xff]  ;;  %v1509_v44 = vld [vmem:[#allocation11 + $0x138] sm:$0xff]  ;;  %s4564_s13 = smin.u32 %s4326_s30, %s5892_s24 }
 0x23d   : > { %v5907_v33 = vand.u32 127, %v7237_v32  ;;  %v5922_v45 = vand.u32 4294901760, %v1512_v42  ;;  %v5924_v46 = vand.u32 4294901760, %v1510_v43  ;;  %v5926_v47 = vand.u32 4294901760, %v1509_v44  ;;  %v1507_v48 = vld [vmem:[#allocation11 + $0x128] sm:$0xff]  ;;  %v1506_v49 = vld [vmem:[#allocation11 + $0x120] sm:$0xff] }
 0x23e   : > { %v5929_v50 = vsub.f32 %v1516_v36, %v5916_v39  ;;  %v5932_v51 = vsub.f32 %v1515_v37, %v5918_v40  ;;  %v5935_v52 = vsub.f32 %v1513_v38, %v5920_v41  ;;  %v5937_v53 = vand.u32 4294901760, %v1507_v48  ;;  %1536 = vmatprep.subr.mxu0 %v5916_v39  ;;  %v1504_v20 = vld [vmem:[#allocation11 + $0x110] sm:$0xff]  ;;  %v1503_v21 = vld [vmem:[#allocation11 + $0x108] sm:$0xff]  ;;  %v1501_v22 = vld [vmem:[#allocation11 + $0xf8] sm:$0xff]  ;;  %p4325_p8 = scmp.lt.s32.totalorder %s5892_s24, 0  ;;  %s4328_s22 = sand.u32 1, %s4564_s13  }
 0x23f   : > { %vm1447_vm4 = vcmp.lt.s32.totalorder %v5907_v33, 16  ;;  %v5941_v54 = vsub.f32 %v1512_v42, %v5922_v45  ;;  %v5944_v55 = vsub.f32 %v1510_v43, %v5924_v46  ;;  %v5947_v58 = vsub.f32 %v1509_v44, %v5926_v47  ;;  %1538 = vmatpush1.msra.mxu0 %v5918_v40  ;;  %v1500_v27 = vld [vmem:[#allocation11 + $0xf0] sm:$0xff]  ;;  %v1498_v29 = vld [vmem:[#allocation11 + $0xe0] sm:$0xff]  ;;  %v1497_v30 = vld [vmem:[#allocation11 + $0xd8] sm:$0xff]  ;;  %s4329_s20 = ssub.s32 0, %s4328_s22  ;;  %s7038_s23 = sshll.u32 %s5523_s19, 2 }
 0x240   : > { %v1448_v34 = vsel %vm1447_vm4, %v5901_v31, -inf  ;;  %v1449_v35 = vsel %vm1447_vm4, %v5897_v28, -inf  ;;  %v5949_v59 = vand.u32 4294901760, %v1506_v49  ;;  %v7252_v60 = vand.u32 4294901760, %v5929_v50  ;;  %1540 = vmatprep.subr.mxu0 %v5920_v41  ;;  %v1495_v37 = vld [vmem:[#allocation11 + $0xc8] sm:$0xff]  ;;  %v1486_v33 = vld [vmem:[#allocation11 + $0x80] sm:$0xff]  ;;  %s7470_s20 = smov (!%p4325_p8, %s4329_s20), %s4328_s22 }
 0x241   : > { %1450 = vmax.xlane.f32.xlu0 %v1448_v34  ;;  %v7251_v3 = vand.u32 4294901760, %v5932_v51  ;;  %v7250_v4 = vand.u32 4294901760, %v5935_v52  ;;  %v5956_v7 = vsub.f32 %v1507_v48, %v5937_v53  ;;  %v7249_v8 = vand.u32 4294901760, %v5941_v54  ;;  %1542 = vmatpush1.msra.mxu0 %v5922_v45  ;;  %v1479_v6 = vld [vmem:[#allocation11 + $0x48] sm:$0xff]  ;;  %v1477_v61 = vld [vmem:[#allocation11 + $0x38] sm:$0xff]  ;;  %s7043_s12 = sld [smem:[#allocation4 + %s7038_s23]] }
 0x242   : > { %v7248_v9 = vand.u32 4294901760, %v5944_v55  ;;  %v7245_v10 = vand.u32 4294901760, %v5947_v58  ;;  %v5963_v11 = vsub.f32 %v1506_v49, %v5949_v59  ;;  %v1657_v12 = vsub.f32 %v5929_v50, %v7252_v60  ;;  %1544 = vmatprep.subr.mxu0 %v5924_v46  ;;  %p4566_p10 = scmp.lt.s32.totalorder %s7470_s20, 0  ;;  %s4335_s28 = sadd.s32 2, %s7470_s20 }
 0x243   : > { %v1663_v13 = vsub.f32 %v5932_v51, %v7251_v3  ;;  %v1669_v14 = vsub.f32 %v5935_v52, %v7250_v4  ;;  %v7243_v15 = vand.u32 4294901760, %v5956_v7  ;;  %v1675_v16 = vsub.f32 %v5941_v54, %v7249_v8  ;;  %1546 = vmatpush1.msra.mxu0 %v5926_v47  ;;  %v1483_v3 = vld [vmem:[#allocation11 + $0x68] sm:$0xff] }
 0x244   : > { %v1681_v17 = vsub.f32 %v5944_v55, %v7248_v9  ;;  %v1687_v18 = vsub.f32 %v5947_v58, %v7245_v10  ;;  %v7241_v19 = vand.u32 4294901760, %v5963_v11  ;;  %v1658_v23 = vand.u32 4294901760, %v1657_v12  ;;  %1548 = vmatprep.subr.mxu0 %v5937_v53  ;;  %s7472_s28 = smov (!%p4566_p10, %s4335_s28), %s7470_s20 }
 0x245   : > { %1452 = vmax.xlane.f32.xlu0 %v1449_v35  ;;  %v1664_v24 = vand.u32 4294901760, %v1663_v13  ;;  %v1670_v25 = vand.u32 4294901760, %v1669_v14  ;;  %v1693_v26 = vsub.f32 %v5956_v7, %v7243_v15  ;;  %v1676_v34 = vand.u32 4294901760, %v1675_v16  ;;  %1550 = vmatpush1.msra.mxu0 %v5949_v59 }
 0x246   : > { %v1682_v35 = vand.u32 4294901760, %v1681_v17  ;;  %v1699_v36 = vsub.f32 %v5963_v11, %v7241_v19  ;;  %1659 = vmatprep.subr.mxu1 %v1658_v23  ;;  %v1688_v38 = vand.u32 4294901760, %v1687_v18  ;;  %v5996_v42 = vand.u32 4294901760, %v1504_v20 }
 0x247   : > { %v5998_v43 = vand.u32 4294901760, %v1503_v21  ;;  %v6000_v44 = vand.u32 4294901760, %v1501_v22  ;;  %1665 = vmatpush1.msra.mxu1 %v1664_v24  ;;  %v1694_v48 = vand.u32 4294901760, %v1693_v26  ;;  %v6002_v49 = vand.u32 4294901760, %v1500_v27  ;;  %p4568_p11 = scmp.lt.s32.totalorder %s7043_s12, 0 }
 0x248   : > { %v6004_v12 = vand.u32 4294901760, %v1498_v29  ;;  %v6006_v13 = vand.u32 4294901760, %v1497_v30  ;;  %1671 = vmatprep.subr.mxu1 %v1670_v25  ;;  %v6009_v14 = vsub.f32 %v1504_v20, %v5996_v42  ;;  %v6017_v18 = vand.u32 4294901760, %v1495_v37  ;;  %1552 = vmatprep.subr.mxu0 %v5996_v42  ;;  %s4569_s11 = sshll.u32 (!%p4568_p11), %s7472_s28, 1 }
 0x249   : > { %v6012_v16 = vsub.f32 %v1503_v21, %v5998_v43  ;;  %v6015_v17 = vsub.f32 %v1501_v22, %v6000_v44  ;;  %1677 = vmatpush1.msra.mxu1 %v1676_v34  ;;  %v1700_v23 = vand.u32 4294901760, %v1699_v36  ;;  %v6021_v24 = vsub.f32 %v1500_v27, %v6002_v49  ;;  %1554 = vmatpush1.msra.mxu0 %v5998_v43 }
 0x24a   : > { %v6024_v25 = vsub.f32 %v1498_v29, %v6004_v12  ;;  %v6027_v20 = vsub.f32 %v1497_v30, %v6006_v13  ;;  %1683 = vmatprep.subr.mxu1 %v1682_v35  ;;  %v7240_v21 = vand.u32 4294901760, %v6009_v14  ;;  %v6034_v34 = vsub.f32 %v1495_v37, %v6017_v18  ;;  %1556 = vmatprep.subr.mxu0 %v6000_v44 }
 0x24b   : > { %v7238_v22 = vand.u32 4294901760, %v6012_v16  ;;  %v7239_v26 = vand.u32 4294901760, %v6015_v17  ;;  %1689 = vmatpush1.msra.mxu1 %v1688_v38  ;;  %v7242_v27 = vand.u32 4294901760, %v6021_v24  ;;  %1558 = vmatpush1.msra.mxu0 %v6002_v49 }
 0x24c   : > { %v7244_v29 = vand.u32 4294901760, %v6024_v25  ;;  %v7246_v30 = vand.u32 4294901760, %v6027_v20  ;;  %1695 = vmatprep.subr.mxu1 %v1694_v48  ;;  %v1705_v35 = vsub.f32 %v6009_v14, %v7240_v21  ;;  %v7247_v38 = vand.u32 4294901760, %v6034_v34  ;;  %1560 = vmatprep.subr.mxu0 %v6004_v12 }
 0x24d   : > { %v1711_v36 = vsub.f32 %v6012_v16, %v7238_v22  ;;  %v1717_v37 = vsub.f32 %v6015_v17, %v7239_v26  ;;  %1701 = vmatpush1.msra.mxu1 %v1700_v23  ;;  %v1723_v48 = vsub.f32 %v6021_v24, %v7242_v27  ;;  %1562 = vmatpush1.msra.mxu0 %v6006_v13 }
 0x24e   : > { %v1729_v32 = vsub.f32 %v6024_v25, %v7244_v29  ;;  %v1735_v22 = vsub.f32 %v6027_v20, %v7246_v30  ;;  %v1706_v26 = vand.u32 4294901760, %v1705_v35  ;;  %v1741_v23 = vsub.f32 %v6034_v34, %v7247_v38  ;;  %1564 = vmatprep.subr.mxu0 %v6017_v18 }
 0x24f   : > { %v1712_v21 = vand.u32 4294901760, %v1711_v36  ;;  %v1718_v19 = vand.u32 4294901760, %v1717_v37  ;;  %v1724_v27 = vand.u32 4294901760, %v1723_v48  ;;  %v1488_v48 = vld [vmem:[#allocation11 + $0x90] sm:$0xff] }
 0x250   : > { %1707 = vmatprep.subr.mxu1 %v1706_v26  ;;  %v1730_v15 = vand.u32 4294901760, %v1729_v32  ;;  %v1736_v29 = vand.u32 4294901760, %v1735_v22  ;;  %v1742_v10 = vand.u32 4294901760, %v1741_v23 }
 0x251   : > { %1713 = vmatpush1.msra.mxu1 %v1712_v21 }
 0x252   : > { %1719 = vmatprep.subr.mxu1 %v1718_v19  ;;  %v1494_v19 = vld [vmem:[#allocation11 + $0xc0] sm:$0xff] }
 0x253   : > { %1725 = vmatpush1.msra.mxu1 %v1724_v27 }
 0x254   : > { %1731 = vmatprep.subr.mxu1 %v1730_v15  ;;  %v6073_v15 = vand.u32 4294901760, %v1494_v19 }
 0x255   : > { %1737 = vmatpush1.msra.mxu1 %v1736_v29 }
 0x256   : > { %1743 = vmatprep.subr.mxu1 %v1742_v10  ;;  %v1492_v10 = vld [vmem:[#allocation11 + $0xb0] sm:$0xff]  ;;  %v6078_v27 = vsub.f32 %v1494_v19, %v6073_v15  ;;  %1566 = vmatpush1.msra.mxu0 %v6073_v15  ;;  %v6105_v19 = vand.u32 4294901760, %v1486_v33 }
 0x257   : > { %v6075_v21 = vand.u32 4294901760, %v1492_v10 }
 0x258   : > { %v7255_v23 = vand.u32 4294901760, %v6078_v27  ;;  %v6123_v57 = vsub.f32 %v1486_v33, %v6105_v19 }
 0x259   : > { %1568 = vmatprep.subr.mxu0 %v6075_v21 }
 0x25a   : > { %7356 = vst [vmem:[#allocation37_spill] sm:$0xff] %v6123_v57  ;;  %v7283_v62 = vand.u32 4294901760, %v6123_v57 }
 0x2ca   : > { %v1451_v35 = vpop.xlane.xlu0 %1450 }
 0x2cb   : > { %v1454_v36 = vsub.f32 %v5901_v31, %v1451_v35  ;;  %v1491_v31 = vld [vmem:[#allocation11 + $0xa8] sm:$0xff] }
 0x2cd   : > { %v1456_v37 = vmul.f32 1.442695, %v1454_v36  ;;  %v6098_v36 = vand.u32 4294901760, %v1488_v48 }
 0x2ce   : > { %v1453_v30 = vpop.xlane.xlu0 %1452 }
 0x2cf   : > { %5275 = vpow2.f32 %v1456_v37  ;;  %v1455_v38 = vsub.f32 %v5897_v28, %v1453_v30  ;;  %v6080_v28 = vand.u32 4294901760, %v1491_v31  ;;  %v6088_v30 = vsub.f32 %v1492_v10, %v6075_v21  ;;  %v1485_v10 = vld [vmem:[#allocation11 + $0x78] sm:$0xff] }
 0x2d0   : > { %v6113_v8 = vsub.f32 %v1488_v48, %v6098_v36  ;;  %v6115_v4 = vand.u32 4294901760, %v1485_v10 }
 0x2d1   : > { %v1458_v9 = vmul.f32 1.442695, %v1455_v38  ;;  %7352 = vst [vmem:[#allocation33_spill] sm:$0xff] %v6088_v30  ;;  %v6096_v35 = vsub.f32 %v1491_v31, %v6080_v28  ;;  %1570 = vmatpush1.msra.mxu0 %v6080_v28  ;;  %v7264_v37 = vand.u32 4294901760, %v6088_v30  ;;  %v1747_v31 = vsub.f32 %v6078_v27, %v7255_v23 }
 0x2d2   : > { %7355 = vst [vmem:[#allocation36_spill] sm:$0xff] %v6113_v8  ;;  %v6125_v23 = vand.u32 4294901760, %v1483_v3  ;;  %v7280_v0 = vand.u32 4294901760, %v6113_v8  ;;  %v6133_v1 = vsub.f32 %v1485_v10, %v6115_v4 }
 0x2d3   : > { %5277 = vpow2.f32 %v1458_v9  ;;  %v1489_v9 = vld [vmem:[#allocation11 + $0x98] sm:$0xff]  ;;  %7353 = vst [vmem:[#allocation34_spill] sm:$0xff] %v6096_v35  ;;  %v1748_v48 = vand.u32 4294901760, %v1747_v31  ;;  %v7357_v56 = vand.u32 4294901760, %v6096_v35 }
 0x2d4   : > { %v6090_v38 = vand.u32 4294901760, %v1489_v9  ;;  %7358 = vst [vmem:[#allocation38_spill] sm:$0xff] %v6133_v1  ;;  %v6141_v31 = vsub.f32 %v1483_v3, %v6125_v23  ;;  %v1771_v10 = vsub.f32 %v6113_v8, %v7280_v0  ;;  %v1777_v3 = vsub.f32 %v6123_v57, %v7283_v62 }
 0x2d5   : > { %v1759_v2 = vsub.f32 %v6096_v35, %v7357_v56  ;;  %1749 = vmatpush1.msra.mxu1 %v1748_v48 }
 0x2d6   : > { %1572 = vmatprep.subr.mxu0 %v6090_v38  ;;  %7359 = vst [vmem:[#allocation39_spill] sm:$0xff] %v6141_v31  ;;  %v1772_v48 = vand.u32 4294901760, %v1771_v10  ;;  %v1778_v62 = vand.u32 4294901760, %v1777_v3  ;;  %v6171_v10 = vand.u32 4294901760, %v1477_v61  ;;  %v1471_v3 = vld [vmem:[#allocation11 + $0x8] sm:$0xff] }
 0x2d7   : > { %1574 = vmatpush1.msra.mxu0 %v6098_v36  ;;  %v1760_v56 = vand.u32 4294901760, %v1759_v2  ;;  %v1476_v2 = vld [vmem:[#allocation11 + $0x30] sm:$0xff] }
 0x2d8   : > { %1576 = vmatprep.subr.mxu0 %v6105_v19  ;;  %7364 = vst [vmem:[#allocation44_spill] sm:$0xff] %v6171_v10 }
 0x2d9   : > { %1578 = vmatpush1.msra.mxu0 %v6115_v4 }
 0x2da   : > { %1580 = vmatprep.subr.mxu0 %v6125_v23 }
 0x2dc   : > { %v5276_v26 = vpop.eup %5275 }
 0x2dd   : > { %v6070_v32 = vsel %vm1447_vm4, %v5276_v26, 0.0  ;;  %v6103_v26 = vsub.f32 %v1489_v9, %v6090_v38  ;;  %v1753_v9 = vsub.f32 %v6088_v30, %v7264_v37  ;;  %v1480_v37 = vld [vmem:[#allocation11 + $0x50] sm:$0xff] }
 0x2de   : > { %1462 = vadd.xlane.f32.xlu1 %v6070_v32  ;;  %v6154_v35 = vand.u32 4294901760, %v1480_v37 }
 0x2df   : > { %7354 = vst [vmem:[#allocation35_spill] sm:$0xff] %v6103_v26  ;;  %v7275_v60 = vand.u32 4294901760, %v6103_v26  ;;  %v1754_v33 = vand.u32 4294901760, %v1753_v9  ;;  %v7286_v9 = vand.u32 4294901760, %v6133_v1 }
 0x2e0   : > { %v5278_v22 = vpop.eup %5277  ;;  %7360 = vst [vmem:[#allocation40_spill] sm:$0xff] %v6154_v35 }
 0x2e1   : > { %v6085_v29 = vsel %vm1447_vm4, %v5278_v22, 0.0  ;;  %v1482_v22 = vld [vmem:[#allocation11 + $0x60] sm:$0xff]  ;;  %v1765_v63 = vsub.f32 %v6103_v26, %v7275_v60  ;;  %1755 = vmatprep.subr.mxu1 %v1754_v33  ;;  %v7291_v26 = vand.u32 4294901760, %v6141_v31  ;;  %v1783_v0 = vsub.f32 %v6133_v1, %v7286_v9  ;;  %v1473_v9 = vld [vmem:[#allocation11 + $0x18] sm:$0xff] }
 0x2e2   : > { %1464 = vadd.xlane.f32.xlu1 %v6085_v29  ;;  %v6148_v5 = vand.u32 4294901760, %v1482_v22  ;;  %1761 = vmatpush1.msra.mxu1 %v1760_v56  ;;  %v6162_v33 = vand.u32 4294901760, %v1479_v6  ;;  %v6169_v56 = vsub.f32 %v1480_v37, %v6154_v35 }
 0x2e3   : > { %v1766_v60 = vand.u32 4294901760, %v1765_v63  ;;  %v1474_v63 = vld [vmem:[#allocation11 + $0x20] sm:$0xff]  ;;  %v1789_v57 = vsub.f32 %v6141_v31, %v7291_v26  ;;  %v6183_v31 = vsub.f32 %v1477_v61, %v6171_v10 }
 0x2e4   : > { %v6160_v8 = vsub.f32 %v1482_v22, %v6148_v5  ;;  %7362 = vst [vmem:[#allocation42_spill] sm:$0xff] %v6162_v33  ;;  %1582 = vmatpush1.msra.mxu0 %v6148_v5  ;;  %7363 = vst [vmem:[#allocation43_spill] sm:$0xff] %v6169_v56  ;;  %v1784_v22 = vand.u32 4294901760, %v1783_v0  ;;  %v6176_v30 = vsub.f32 %v1479_v6, %v6162_v33  ;;  %v7303_v26 = vand.u32 4294901760, %v6169_v56  ;;  %v1470_v6 = vld [vmem:[#allocation11] sm:$0xff] }
 0x2e5   : > { %1767 = vmatprep.subr.mxu1 %v1766_v60  ;;  %1584 = vmatprep.subr.mxu0 %v6154_v35  ;;  %v6178_v60 = vand.u32 4294901760, %v1476_v2  ;;  %v1790_v37 = vand.u32 4294901760, %v1789_v57  ;;  %7367 = vst [vmem:[#allocation47_spill] sm:$0xff] %v6183_v31  ;;  %v6185_v35 = vand.u32 4294901760, %v1474_v63  ;;  %v6195_v57 = vand.u32 4294901760, %v1473_v9 }
 0x2e6   : > { %7361 = vst [vmem:[#allocation41_spill] sm:$0xff] %v6160_v8  ;;  %1773 = vmatpush1.msra.mxu1 %v1772_v48  ;;  %v7296_v1 = vand.u32 4294901760, %v6160_v8  ;;  %7365 = vst [vmem:[#allocation45_spill] sm:$0xff] %v6176_v30  ;;  %1586 = vmatpush1.msra.mxu0 %v6162_v33  ;;  %v1801_v61 = vsub.f32 %v6169_v56, %v7303_v26 }
 0x2e7   : > { %7366 = vst [vmem:[#allocation46_spill] sm:$0xff] %v6178_v60  ;;  %1779 = vmatprep.subr.mxu1 %v1778_v62  ;;  %1588 = vmatprep.subr.mxu0 %v6171_v10  ;;  %v6193_v48 = vsub.f32 %v1476_v2, %v6178_v60  ;;  %7368 = vst [vmem:[#allocation48_spill] sm:$0xff] %v6195_v57  ;;  %v7310_v62 = vand.u32 4294901760, %v6183_v31  ;;  %v6213_v10 = vsub.f32 %v1473_v9, %v6195_v57 }
 0x2e8   : > { %1785 = vmatpush1.msra.mxu1 %v1784_v22  ;;  %v1795_v0 = vsub.f32 %v6160_v8, %v7296_v1  ;;  %1590 = vmatpush1.msra.mxu0 %v6178_v60  ;;  %v6203_v22 = vsub.f32 %v1474_v63, %v6185_v35  ;;  %v6205_v1 = vand.u32 4294901760, %v1471_v3  ;;  %v7370_v8 = vand.u32 4294901760, %v6176_v30 }
 0x2e9   : > { %1791 = vmatprep.subr.mxu1 %v1790_v37  ;;  %1592 = vmatprep.subr.mxu0 %v6185_v35  ;;  %v7317_v37 = vand.u32 4294901760, %v6193_v48  ;;  %v1802_v26 = vand.u32 4294901760, %v1801_v61  ;;  %v1813_v63 = vsub.f32 %v6183_v31, %v7310_v62  ;;  %v6228_v61 = vand.u32 4294901760, %v1470_v6 }
 0x2ea   : > { %7369 = vst [vmem:[#allocation49_spill] sm:$0xff] %v6205_v1  ;;  %v1796_v2 = vand.u32 4294901760, %v1795_v0  ;;  %v1807_v60 = vsub.f32 %v6176_v30, %v7370_v8  ;;  %1594 = vmatpush1.msra.mxu0 %v6195_v57  ;;  %v7313_v56 = vand.u32 4294901760, %v6203_v22  ;;  %v6221_v0 = vsub.f32 %v1471_v3, %v6205_v1 }
 0x2eb   : > { %1596 = vmatprep.subr.mxu0 %v6205_v1  ;;  %v1819_v9 = vsub.f32 %v6193_v48, %v7317_v37  ;;  %v7316_v30 = vand.u32 4294901760, %v6213_v10  ;;  %v1814_v57 = vand.u32 4294901760, %v1813_v63  ;;  %v7380_v37 = vld [vmem:[#allocation36_spill] sm:$0xff] }
 0x2ec   : > { %1797 = vmatpush1.msra.mxu1 %v1796_v2  ;;  %v1808_v8 = vand.u32 4294901760, %v1807_v60  ;;  %v1825_v62 = vsub.f32 %v6203_v22, %v7313_v56  ;;  %v7315_v3 = vand.u32 4294901760, %v6221_v0  ;;  %v6238_v2 = vsub.f32 %v1470_v6, %v6228_v61  ;;  %1598 = vmatpush1.msra.mxu0 %v6228_v61 }
 0x2ed   : > { %1803 = vmatprep.subr.mxu1 %v1802_v26  ;;  %v1820_v31 = vand.u32 4294901760, %v1819_v9  ;;  %v1831_v60 = vsub.f32 %v6213_v10, %v7316_v30  ;;  %1895 = vmatprep.subr.mxu0 %v5929_v50  ;;  %v7379_v30 = vld [vmem:[#allocation44_spill] sm:$0xff] }
 0x2ee   : > { %1809 = vmatpush1.msra.mxu1 %v1808_v8  ;;  %v1826_v26 = vand.u32 4294901760, %v1825_v62  ;;  %v1837_v63 = vsub.f32 %v6221_v0, %v7315_v3  ;;  %v7314_v9 = vand.u32 4294901760, %v6238_v2  ;;  %v7378_v3 = vld [vmem:[#allocation35_spill] sm:$0xff] }
 0x2ef   : > { %1815 = vmatprep.subr.mxu1 %v1814_v57  ;;  %v1832_v8 = vand.u32 4294901760, %v1831_v60  ;;  %v7318_v57 = vmov 0.0  }
 0x2f0   : > { %1821 = vmatpush1.msra.mxu1 %v1820_v31  ;;  %v1838_v56 = vand.u32 4294901760, %v1837_v63  ;;  %v1843_v6 = vsub.f32 %v6238_v2, %v7314_v9  ;;  %1878 = vmatprep.mubr.f32.mxu1 %v7318_v57 }
 0x2f1   : > { %1827 = vmatprep.subr.mxu1 %v1826_v26  ;;  %1631 = vmatprep.mubr.f32.mxu0 %v7318_v57 }
 0x2f2   : > { %1833 = vmatpush1.msra.mxu1 %v1832_v8  ;;  %v1844_v62 = vand.u32 4294901760, %v1843_v6 }
 0x2f3   : > { %1839 = vmatprep.subr.mxu1 %v1838_v56 }
 0x2f4   : > { %1845 = vmatpush1.msra.mxu1 %v1844_v62 }
 0x2f5   : > { %2039 = vmatprep.subr.mxu1 %v5916_v39 }
 0x367   : > { %v1463_v31 = vpop.xlane.xlu1 %1462 }
 0x368   : > { %5279 = vrcp.f32 %v1463_v31 }
 0x36b   : > { %v1465_v60 = vpop.xlane.xlu1 %1464 }
 0x36c   : > { %5281 = vrcp.f32 %v1465_v60 }
 0x375   : > { %v5280_v26 = vpop.eup %5279 }
 0x376   : > { %v1467_v63 = vmul.f32 %v5280_v26, %v6070_v32 }
 0x378   : > { %v6253_v8 = vand.u32 4294901760, %v1467_v63 }
 0x379   : > { %v5282_v9 = vpop.eup %5281 }
 0x37a   : > { %7371 = vst [vmem:[#allocation50_spill] sm:$0xff] %v6253_v8  ;;  %v1469_v56 = vmul.f32 %v5282_v9, %v6085_v29  ;;  %1880 = vmatmul.mubr.f32.vlgmr.msra.gmra.mxu1 %v6253_v8  ;;  %v6258_v6 = vsub.f32 %v1467_v63, %v6253_v8  ;;  %v7385_v8 = vld [vmem:[#allocation39_spill] sm:$0xff] }
 0x37b   : > { %2041 = vmatpush1.msra.mxu1 %v5918_v40  ;;  %1885 = vmatprep.mubr.f32.mxu1 %v7318_v57 }
 0x37c   : > { %v6262_v62 = vand.u32 4294901760, %v1469_v56  ;;  %2043 = vmatprep.subr.mxu1 %v5920_v41  ;;  %v6266_v32 = vand.u32 4294901760, %v6258_v6 }
 0x37d   : > { %2045 = vmatpush1.msra.mxu1 %v5922_v45 }
 0x37e   : > { %7372 = vst [vmem:[#allocation51_spill] sm:$0xff] %v6262_v62  ;;  %2047 = vmatprep.subr.mxu1 %v5924_v46  ;;  %1887 = vmatmul.mubr.f32.gmra.mxu1 %v6262_v62  ;;  %v1635_v29 = vsub.f32 %v6258_v6, %v6266_v32  ;;  %v6274_v9 = vsub.f32 %v1469_v56, %v6262_v62  ;;  %v7375_v56 = vld [vmem:[#allocation33_spill] sm:$0xff]  ;;  %v7384_v62 = vld [vmem:[#allocation48_spill] sm:$0xff] }
 0x37f   : > { %2049 = vmatpush1.msra.mxu1 %v5926_v47  ;;  %2134 = vmatprep.mubr.f32.mxu1 %v7318_v57 }
 0x380   : > { %2051 = vmatprep.subr.mxu1 %v5937_v53  ;;  %v6279_v31 = vand.u32 4294901760, %v1635_v29  ;;  %v6282_v60 = vand.u32 4294901760, %v6274_v9  ;;  %v7376_v29 = vld [vmem:[#allocation40_spill] sm:$0xff] }
 0x381   : > { %2053 = vmatpush1.msra.mxu1 %v5949_v59 }
 0x382   : > { %7373 = vst [vmem:[#allocation52_spill] sm:$0xff] %v6279_v31  ;;  %2055 = vmatprep.subr.mxu1 %v5996_v42  ;;  %1637 = vmatmul.mubr.f32.vlgmr.msra.gmra.mxu0 %v6279_v31  ;;  %v1646_v26 = vsub.f32 %v6274_v9, %v6282_v60  ;;  %v7383_v31 = vld [vmem:[#allocation38_spill] sm:$0xff] }
 0x383   : > { %1898 = vmatpush1.msra.mxu0 %v5932_v51  ;;  %2057 = vmatpush1.msra.mxu1 %v5998_v43 }
 0x384   : > { %1901 = vmatprep.subr.mxu0 %v5935_v52  ;;  %2059 = vmatprep.subr.mxu1 %v6000_v44  ;;  %v6293_v63 = vand.u32 4294901760, %v1646_v26  ;;  %v7377_v26 = vld [vmem:[#allocation34_spill] sm:$0xff] }
 0x385   : > { %1904 = vmatpush1.msra.mxu0 %v5941_v54  ;;  %2061 = vmatpush1.msra.mxu1 %v6002_v49 }
 0x386   : > { %7374 = vst [vmem:[#allocation53_spill] sm:$0xff] %v6293_v63  ;;  %1642 = vmatprep.mubr.f32.mxu0 %v7318_v57  ;;  %1907 = vmatprep.subr.mxu0 %v5944_v55  ;;  %v7381_v57 = vld [vmem:[#allocation46_spill] sm:$0xff] }
 0x387   : > { %2063 = vmatprep.subr.mxu1 %v6004_v12  ;;  %1648 = vmatmul.mubr.f32.gmra.mxu0 %v6293_v63  ;;  %v7382_v63 = vld [vmem:[#allocation37_spill] sm:$0xff] }
 0x388   : > { %1910 = vmatpush1.msra.mxu0 %v5947_v58  ;;  %2065 = vmatpush1.msra.mxu1 %v6006_v13 }
 0x389   : > { %1913 = vmatprep.subr.mxu0 %v5956_v7  ;;  %2067 = vmatprep.subr.mxu1 %v6017_v18 }
 0x38a   : > { %1916 = vmatpush1.msra.mxu0 %v5963_v11  ;;  %2069 = vmatpush1.msra.mxu1 %v6073_v15 }
 0x38b   : > { %1919 = vmatprep.subr.mxu0 %v6009_v14  ;;  %2071 = vmatprep.subr.mxu1 %v6075_v21 }
 0x38c   : > { %1922 = vmatpush1.msra.mxu0 %v6012_v16  ;;  %2073 = vmatpush1.msra.mxu1 %v6080_v28 }
 0x38d   : > { %1925 = vmatprep.subr.mxu0 %v6015_v17  ;;  %2075 = vmatprep.subr.mxu1 %v6090_v38 }
 0x38e   : > { %1928 = vmatpush1.msra.mxu0 %v6021_v24  ;;  %2077 = vmatpush1.msra.mxu1 %v6098_v36 }
 0x38f   : > { %1931 = vmatprep.subr.mxu0 %v6024_v25  ;;  %2079 = vmatprep.subr.mxu1 %v6105_v19 }
 0x390   : > { %1934 = vmatpush1.msra.mxu0 %v6027_v20  ;;  %2081 = vmatpush1.msra.mxu1 %v6115_v4 }
 0x391   : > { %1937 = vmatprep.subr.mxu0 %v6034_v34  ;;  %2083 = vmatprep.subr.mxu1 %v6125_v23 }
 0x392   : > { %1940 = vmatpush1.msra.mxu0 %v6078_v27  ;;  %2085 = vmatpush1.msra.mxu1 %v6148_v5 }
 0x393   : > { %1943 = vmatprep.subr.mxu0 %v7375_v56  ;;  %2087 = vmatprep.subr.mxu1 %v7376_v29 }
 0x394   : > { %1946 = vmatpush1.msra.mxu0 %v7377_v26  ;;  %2089 = vmatpush1.msra.mxu1 %v6162_v33  ;;  %v7386_v33 = vld [vmem:[#allocation41_spill] sm:$0xff] }
 0x395   : > { %1949 = vmatprep.subr.mxu0 %v7378_v3  ;;  %2091 = vmatprep.subr.mxu1 %v7379_v30  ;;  %v7387_v30 = vld [vmem:[#allocation43_spill] sm:$0xff] }
 0x396   : > { %1952 = vmatpush1.msra.mxu0 %v7380_v37  ;;  %2093 = vmatpush1.msra.mxu1 %v7381_v57 }
 0x397   : > { %1955 = vmatprep.subr.mxu0 %v7382_v63  ;;  %2095 = vmatprep.subr.mxu1 %v6185_v35  ;;  %v7388_v63 = vld [vmem:[#allocation45_spill] sm:$0xff] }
 0x398   : > { %1958 = vmatpush1.msra.mxu0 %v7383_v31  ;;  %2097 = vmatpush1.msra.mxu1 %v7384_v62  ;;  %v7389_v31 = vld [vmem:[#allocation47_spill] sm:$0xff] }
 0x399   : > { %1961 = vmatprep.subr.mxu0 %v7385_v8  ;;  %2099 = vmatprep.subr.mxu1 %v6205_v1  ;;  %v7390_v1 = vmov 0.0  }
 0x39a   : > { %1964 = vmatpush1.msra.mxu0 %v7386_v33  ;;  %2101 = vmatpush1.msra.mxu1 %v6228_v61 }
 0x39b   : > { %1967 = vmatprep.subr.mxu0 %v7387_v30  ;;  %2138 = vmatmul.mubr.f32.vlgmr.msra.gmra.mxu1 %v6266_v32 }
 0x39c   : > { %2329 = vmatprep.subr.mxu1 %v5916_v39  ;;  %1970 = vmatpush1.msra.mxu0 %v7388_v63  ;;  %v7391_v39 = vand.u32 4294901760, %v5929_v50  ;;  %v7396_v50 = vand.u32 4294901760, %v5947_v58 }
 0x39d   : > { %2331 = vmatpush1.msra.mxu1 %v5918_v40  ;;  %1973 = vmatprep.subr.mxu0 %v7389_v31  ;;  %v7392_v40 = vand.u32 4294901760, %v5932_v51  ;;  %v1514_v51 = vld [vmem:[#allocation11 + $0x160] sm:$0xff] }
 0x39e   : > { %2333 = vmatprep.subr.mxu1 %v5920_v41  ;;  %1976 = vmatpush1.msra.mxu0 %v6193_v48  ;;  %v7393_v41 = vand.u32 4294901760, %v5935_v52  ;;  %v7397_v52 = vand.u32 4294901760, %v5956_v7  ;;  %v6390_v58 = vand.u32 4294901760, %v1514_v51  ;;  %v7400_v7 = vand.u32 4294901760, %v6012_v16 }
 0x39f   : > { %2143 = vmatprep.mubr.f32.mxu1 %v7390_v1  ;;  %2335 = vmatpush1.msra.mxu1 %v5922_v45  ;;  %v7394_v45 = vand.u32 4294901760, %v5941_v54  ;;  %v7398_v54 = vand.u32 4294901760, %v5963_v11 }
 0x3a0   : > { %1979 = vmatprep.subr.mxu0 %v6203_v22  ;;  %2147 = vmatmul.mubr.f32.gmra.mxu1 %v6282_v60 }
 0x3a1   : > { %2337 = vmatprep.subr.mxu1 %v5924_v46  ;;  %1982 = vmatpush1.msra.mxu0 %v6213_v10  ;;  %v1517_v46 = vld [vmem:[#allocation11 + $0x178] sm:$0xff] }
 0x3a2   : > { %2339 = vmatpush1.msra.mxu1 %v5926_v47  ;;  %1985 = vmatprep.subr.mxu0 %v6221_v0  ;;  %v7395_v47 = vand.u32 4294901760, %v5944_v55  ;;  %v7399_v55 = vand.u32 4294901760, %v6009_v14  ;;  %v7404_v14 = vand.u32 4294901760, %v6027_v20  ;;  %v1502_v20 = vld [vmem:[#allocation11 + $0x100] sm:$0xff] }
 0x3a3   : > { %2341 = vmatprep.subr.mxu1 %v5937_v53  ;;  %1988 = vmatpush1.msra.mxu0 %v6238_v2  ;;  %v6382_v53 = vand.u32 4294901760, %v1517_v46 }
 0x3a4   : > { %2021 = vmatprep.mubr.f32.mxu0 %v7390_v1  ;;  %2343 = vmatpush1.msra.mxu1 %v5949_v59  ;;  %v1511_v59 = vld [vmem:[#allocation11 + $0x148] sm:$0xff] }
 0x3a5   : > { %2024 = vmatmul.mubr.f32.vlgmr.msra.gmra.mxu0 %v6258_v6  ;;  %2156 = vmatprep.subr.mxu0 %v7391_v39  ;;  %v6399_v11 = vsub.f32 %v1517_v46, %v6382_v53  ;;  %v7413_v39 = vld [vmem:[#allocation37_spill] sm:$0xff]  ;;  %v7415_v46 = vld [vmem:[#allocation38_spill] sm:$0xff] }
 0x3a6   : > { %2345 = vmatprep.subr.mxu1 %v5996_v42  ;;  %2160 = vmatpush1.msra.mxu0 %v7392_v40  ;;  %v7401_v42 = vand.u32 4294901760, %v6015_v17  ;;  %v1505_v17 = vld [vmem:[#allocation11 + $0x118] sm:$0xff]  ;;  %v7414_v40 = vand.u32 4294901760, %v7413_v39  ;;  %v7427_v39 = vand.u32 4294901760, %v6213_v10 }
 0x3a7   : > { %2347 = vmatpush1.msra.mxu1 %v5998_v43  ;;  %2164 = vmatprep.subr.mxu0 %v7393_v41  ;;  %v1508_v43 = vld [vmem:[#allocation11 + $0x130] sm:$0xff] }
 0x3a8   : > { %2349 = vmatprep.subr.mxu1 %v6000_v44  ;;  %2029 = vmatprep.mubr.f32.mxu0 %v7390_v1  ;;  %v7402_v44 = vand.u32 4294901760, %v6021_v24  ;;  %v6415_v16 = vand.u32 4294901760, %v1508_v43  ;;  %v6421_v24 = vand.u32 4294901760, %v6399_v11 }
 0x3a9   : > { %2168 = vmatpush1.msra.mxu0 %v7394_v45  ;;  %2351 = vmatpush1.msra.mxu1 %v6002_v49  ;;  %v6404_v49 = vand.u32 4294901760, %v1511_v59  ;;  %v1496_v45 = vld [vmem:[#allocation11 + $0xd0] sm:$0xff] }
 0x3aa   : > { %2032 = vmatmul.mubr.f32.gmra.mxu0 %v6274_v9  ;;  %2172 = vmatprep.subr.mxu0 %v7395_v47 }
 0x3ab   : > { %2353 = vmatprep.subr.mxu1 %v6004_v12  ;;  %2176 = vmatpush1.msra.mxu0 %v7396_v50  ;;  %v7403_v12 = vand.u32 4294901760, %v6024_v25  ;;  %v7406_v25 = vand.u32 4294901760, %v6078_v27  ;;  %v6441_v27 = vsub.f32 %v1508_v43, %v6415_v16  ;;  %v7421_v43 = vld [vmem:[#allocation50_spill] sm:$0xff] }
 0x3ac   : > { %2355 = vmatpush1.msra.mxu1 %v6006_v13  ;;  %2180 = vmatprep.subr.mxu0 %v7397_v52  ;;  %v6410_v13 = vsub.f32 %v1514_v51, %v6390_v58 }
 0x3ad   : > { %2357 = vmatprep.subr.mxu1 %v6017_v18  ;;  %2184 = vmatpush1.msra.mxu0 %v7398_v54  ;;  %v7405_v18 = vand.u32 4294901760, %v6034_v34  ;;  %v6435_v34 = vand.u32 4294901760, %v1505_v17  ;;  %v6468_v47 = vand.u32 4294901760, %v6441_v27  ;;  %v7418_v54 = vld [vmem:[#allocation49_spill] sm:$0xff] }
 0x3ae   : > { %2359 = vmatpush1.msra.mxu1 %v6073_v15  ;;  %2188 = vmatprep.subr.mxu0 %v7399_v55  ;;  %v6427_v15 = vsub.f32 %v1511_v59, %v6404_v49  ;;  %v6483_v59 = vand.u32 4294901760, %v1496_v45 }
 0x3af   : > { %2361 = vmatprep.subr.mxu1 %v6075_v21  ;;  %2192 = vmatpush1.msra.mxu0 %v7400_v7  ;;  %v7407_v21 = vand.u32 4294901760, %v7375_v56  ;;  %v7411_v56 = vld [vmem:[#allocation44_spill] sm:$0xff]  ;;  %v6462_v41 = vsub.f32 %v1505_v17, %v6435_v34  ;;  %v1493_v7 = vld [vmem:[#allocation11 + $0xb8] sm:$0xff] }
 0x3b0   : > { %2363 = vmatpush1.msra.mxu1 %v6080_v28  ;;  %2196 = vmatprep.subr.mxu0 %v7401_v42  ;;  %v7408_v28 = vand.u32 4294901760, %v7377_v26  ;;  %v6454_v26 = vand.u32 4294901760, %v6427_v15  ;;  %v7420_v42 = vand.u32 4294901760, %v7387_v30  ;;  %v6503_v17 = vand.u32 4294901760, %v1493_v7 }
 0x3b1   : > { %2365 = vmatprep.subr.mxu1 %v6090_v38  ;;  %2200 = vmatpush1.msra.mxu0 %v7402_v44  ;;  %v7409_v38 = vld [vmem:[#allocation42_spill] sm:$0xff]  ;;  %v7423_v30 = vand.u32 4294901760, %v7389_v31 }
 0x3b2   : > { %2367 = vmatpush1.msra.mxu1 %v6098_v36  ;;  %2204 = vmatprep.subr.mxu0 %v7403_v12  ;;  %v6448_v36 = vand.u32 4294901760, %v1502_v20  ;;  %v2558_v55 = vsub.f32 %v6427_v15, %v6454_v26  ;;  %v1490_v12 = vld [vmem:[#allocation11 + $0xa0] sm:$0xff] }
 0x3b3   : > { %2369 = vmatprep.subr.mxu1 %v6105_v19  ;;  %2208 = vmatpush1.msra.mxu0 %v7404_v14  ;;  %v1499_v19 = vld [vmem:[#allocation11 + $0xe8] sm:$0xff] }
 0x3b4   : > { %2371 = vmatpush1.msra.mxu1 %v6115_v4  ;;  %2212 = vmatprep.subr.mxu0 %v7405_v18  ;;  %v6433_v4 = vand.u32 4294901760, %v6410_v13  ;;  %v6470_v50 = vand.u32 4294901760, %v1499_v19  ;;  %v6476_v52 = vsub.f32 %v1502_v20, %v6448_v36  ;;  %v2559_v18 = vand.u32 4294901760, %v2558_v55  ;;  %v1487_v20 = vld [vmem:[#allocation11 + $0x88] sm:$0xff] }
 0x3b5   : > { %2373 = vmatprep.subr.mxu1 %v6125_v23  ;;  %2216 = vmatpush1.msra.mxu0 %v7406_v25  ;;  %v2544_v23 = vsub.f32 %v6399_v11, %v6421_v24  ;;  %v6508_v25 = vsub.f32 %v1496_v45, %v6483_v59 }
 0x3b6   : > { %2375 = vmatpush1.msra.mxu1 %v6148_v5  ;;  %2220 = vmatprep.subr.mxu0 %v7407_v21  ;;  %v7410_v5 = vand.u32 4294901760, %v7378_v3  ;;  %v2551_v3 = vsub.f32 %v6410_v13, %v6433_v4  ;;  %v6496_v44 = vsub.f32 %v1499_v19, %v6470_v50  ;;  %v6501_v14 = vand.u32 4294901760, %v6476_v52  ;;  %v7426_v19 = vld [vmem:[#allocation51_spill] sm:$0xff] }
 0x3b7   : > { %2377 = vmatprep.subr.mxu1 %v7376_v29  ;;  %2224 = vmatpush1.msra.mxu0 %v7408_v28  ;;  %v7412_v29 = vand.u32 4294901760, %v7380_v37  ;;  %v7416_v37 = vand.u32 4294901760, %v7415_v46  ;;  %v2545_v51 = vand.u32 4294901760, %v2544_v23  ;;  %v7424_v21 = vand.u32 4294901760, %v6193_v48 }
 0x3b8   : > { %2379 = vmatpush1.msra.mxu1 %v7409_v38  ;;  %2228 = vmatprep.subr.mxu0 %v7410_v5  ;;  %v6514_v28 = vand.u32 4294901760, %v1490_v12  ;;  %v6518_v31 = vand.u32 4294901760, %v6496_v44  ;;  %v1484_v5 = vld [vmem:[#allocation11 + $0x70] sm:$0xff]  ;;  %v7425_v23 = vand.u32 4294901760, %v6203_v22  ;;  %v2579_v48 = vsub.f32 %v6476_v52, %v6501_v14 }
 0x3b9   : > { %2381 = vmatprep.subr.mxu1 %v7411_v56  ;;  %2232 = vmatpush1.msra.mxu0 %v7412_v29  ;;  %v6526_v56 = vsub.f32 %v1493_v7, %v6503_v17  ;;  %v6528_v29 = vand.u32 4294901760, %v1487_v20  ;;  %v6539_v46 = vand.u32 4294901760, %v1484_v5 }
 0x3ba   : > { %2383 = vmatpush1.msra.mxu1 %v7381_v57  ;;  %2236 = vmatprep.subr.mxu0 %v7414_v40  ;;  %v7417_v57 = vand.u32 4294901760, %v7385_v8  ;;  %v2552_v8 = vand.u32 4294901760, %v2551_v3  ;;  %v6533_v40 = vand.u32 4294901760, %v6508_v25  ;;  %v1481_v3 = vld [vmem:[#allocation11 + $0x58] sm:$0xff]  ;;  %v6537_v45 = vsub.f32 %v1490_v12, %v6514_v28 }
 0x3bb   : > { %2385 = vmatprep.subr.mxu1 %v6185_v35  ;;  %2240 = vmatpush1.msra.mxu0 %v7416_v37  ;;  %v7419_v35 = vand.u32 4294901760, %v7386_v33  ;;  %v2565_v33 = vsub.f32 %v6441_v27, %v6468_v47  ;;  %v7428_v37 = vand.u32 4294901760, %v6221_v0  ;;  %v2586_v10 = vsub.f32 %v6496_v44, %v6518_v31 }
 0x3bc   : > { %2387 = vmatpush1.msra.mxu1 %v7384_v62  ;;  %2244 = vmatprep.subr.mxu0 %v7417_v57  ;;  %v6488_v62 = vand.u32 4294901760, %v6462_v41  ;;  %v1478_v57 = vld [vmem:[#allocation11 + $0x40] sm:$0xff]  ;;  %v6552_v55 = vsub.f32 %v1487_v20, %v6528_v29  ;;  %v6554_v7 = vand.u32 4294901760, %v1481_v3  ;;  %v2593_v0 = vsub.f32 %v6508_v25, %v6533_v40 }
 0x3bd   : > { %2389 = vmatprep.subr.mxu1 %v7418_v54  ;;  %2248 = vmatpush1.msra.mxu0 %v7419_v35  ;;  %v2566_v38 = vand.u32 4294901760, %v2565_v33  ;;  %v2580_v54 = vand.u32 4294901760, %v2579_v48  ;;  %v6549_v35 = vand.u32 4294901760, %v6526_v56  ;;  %v6566_v33 = vand.u32 4294901760, %v1478_v57 }
 0x3be   : > { %2391 = vmatpush1.msra.mxu1 %v6228_v61  ;;  %2424 = vmatprep.mubr.f32.mxu1 %v7390_v1  ;;  %v7422_v61 = vand.u32 4294901760, %v7388_v63  ;;  %v2572_v63 = vsub.f32 %v6462_v41, %v6488_v62  ;;  %v2587_v12 = vand.u32 4294901760, %v2586_v10  ;;  %v6576_v20 = vsub.f32 %v1481_v3, %v6554_v7 }
 0x3bf   : > { %2252 = vmatprep.subr.mxu0 %v7420_v42  ;;  %2426 = vmatmul.mubr.f32.vlgmr.msra.gmra.mxu1 %v7421_v43  ;;  %v6564_v42 = vsub.f32 %v1484_v5, %v6539_v46 }
 0x3c0   : > { %4915 = vmatprep.subr.mxu1 %v2545_v51  ;;  %2256 = vmatpush1.msra.mxu0 %v7422_v61  ;;  %v2573_v22 = vand.u32 4294901760, %v2572_v63  ;;  %v1472_v61 = vld [vmem:[#allocation11 + $0x10] sm:$0xff]  ;;  %v2594_v63 = vand.u32 4294901760, %v2593_v0 }
 0x3c1   : > { %4916 = vmatpush3.msra.mxu1 %v2545_v51  ;;  %2260 = vmatprep.subr.mxu0 %v7423_v30  ;;  %v7429_v51 = vand.u32 4294901760, %v6238_v2  ;;  %v6561_v2 = vand.u32 4294901760, %v6537_v45  ;;  %v2600_v30 = vsub.f32 %v6526_v56, %v6549_v35  ;;  %v6586_v5 = vand.u32 4294901760, %v6564_v42 }
 0x3c2   : > { %4917 = vmatprep.subr.mxu1 %v2552_v8  ;;  %2264 = vmatpush1.msra.mxu0 %v7424_v21  ;;  %v6591_v48 = vand.u32 4294901760, %v1472_v61 }
 0x3c3   : > { %2431 = vmatprep.mubr.f32.mxu1 %v7390_v1  ;;  %4918 = vmatpush3.msra.mxu1 %v2552_v8  ;;  %v1475_v8 = vld [vmem:[#allocation11 + $0x28] sm:$0xff]  ;;  %v2601_v3 = vand.u32 4294901760, %v2600_v30 }
 0x3c4   : > { %2268 = vmatprep.subr.mxu0 %v7425_v23  ;;  %2433 = vmatmul.mubr.f32.gmra.mxu1 %v7426_v19  ;;  %v6578_v21 = vand.u32 4294901760, %v1475_v8  ;;  %v6589_v23 = vsub.f32 %v1478_v57, %v6566_v33  ;;  %v6612_v0 = vsub.f32 %v1472_v61, %v6591_v48 }
 0x3c5   : > { %4919 = vmatprep.subr.mxu1 %v2559_v18  ;;  %2272 = vmatpush1.msra.mxu0 %v7427_v39  ;;  %v7430_v39 = vld [vmem:[#allocation52_spill] sm:$0xff] }
 0x3c6   : > { %4920 = vmatpush3.msra.mxu1 %v2559_v18  ;;  %4947 = vmatprep.mubr.f32.mxu1 %v7421_v43  ;;  %v6573_v18 = vand.u32 4294901760, %v6552_v55  ;;  %v6602_v10 = vsub.f32 %v1475_v8, %v6578_v21 }
 0x3c7   : > { %2276 = vmatprep.subr.mxu0 %v7428_v37  ;;  %4921 = vmatprep.subr.mxu1 %v2566_v38  ;;  %v6599_v37 = vand.u32 4294901760, %v6576_v20 }
 0x3c8   : > { %2280 = vmatpush1.msra.mxu0 %v7429_v51  ;;  %2313 = vmatprep.mubr.f32.mxu0 %v7390_v1  ;;  %v2621_v51 = vsub.f32 %v6564_v42, %v6586_v5  ;;  %v6619_v30 = vand.u32 4294901760, %v6602_v10 }
 0x3c9   : > { %4922 = vmatpush3.msra.mxu1 %v2566_v38  ;;  %2315 = vmatmul.mubr.f32.vlgmr.msra.gmra.mxu0 %v7421_v43  ;;  %v2607_v38 = vsub.f32 %v6537_v45, %v6561_v2 }
 0x3ca   : > { %4880 = vmatprep.subr.mxu0 %v6382_v53  ;;  %4923 = vmatprep.subr.mxu1 %v2573_v22  ;;  %v2622_v61 = vand.u32 4294901760, %v2621_v51 }
 0x3cb   : > { %4881 = vmatpush3.msra.mxu0 %v6382_v53  ;;  %4924 = vmatpush3.msra.mxu1 %v2573_v22  ;;  %v2614_v22 = vsub.f32 %v6552_v55, %v6573_v18  ;;  %v2608_v57 = vand.u32 4294901760, %v2607_v38  ;;  %v6626_v38 = vand.u32 4294901760, %v6612_v0 }
 0x3cc   : > { %4882 = vmatprep.subr.mxu0 %v6390_v58  ;;  %4925 = vmatprep.subr.mxu1 %v2580_v54 }
 0x3cd   : > { %2320 = vmatprep.mubr.f32.mxu0 %v7390_v1  ;;  %4883 = vmatpush3.msra.mxu0 %v6390_v58  ;;  %v2615_v8 = vand.u32 4294901760, %v2614_v22  ;;  %v2649_v51 = vsub.f32 %v6612_v0, %v6626_v38 }
 0x3ce   : > { %4926 = vmatpush3.msra.mxu1 %v2580_v54  ;;  %2322 = vmatmul.mubr.f32.gmra.mxu0 %v7426_v19  ;;  %v6609_v54 = vand.u32 4294901760, %v6589_v23 }
 0x3cf   : > { %4884 = vmatprep.subr.mxu0 %v6404_v49  ;;  %4927 = vmatprep.subr.mxu1 %v2587_v12 }
 0x3d0   : > { %4885 = vmatpush3.msra.mxu0 %v6404_v49  ;;  %4912 = vmatprep.mubr.f32.mxu0 %v7430_v39 }
 0x3d1   : > { %4928 = vmatpush3.msra.mxu1 %v2587_v12  ;;  %4886 = vmatprep.subr.mxu0 %v6415_v16  ;;  %v2628_v12 = vsub.f32 %v6576_v20, %v6599_v37 }
 0x3d2   : > { %4929 = vmatprep.subr.mxu1 %v2594_v63  ;;  %4887 = vmatpush3.msra.mxu0 %v6415_v16 }
 0x3d3   : > { %4930 = vmatpush3.msra.mxu1 %v2594_v63  ;;  %4888 = vmatprep.subr.mxu0 %v6435_v34  ;;  %v2635_v63 = vsub.f32 %v6589_v23, %v6609_v54  ;;  %v2629_v39 = vand.u32 4294901760, %v2628_v12  ;;  %v7434_v12 = vld [vmem:[#allocation32_spill] sm:$0xff] }
 0x3d4   : > { %4931 = vmatprep.subr.mxu1 %v2601_v3  ;;  %4889 = vmatpush3.msra.mxu0 %v6435_v34 }
 0x3d5   : > { %4932 = vmatpush3.msra.mxu1 %v2601_v3  ;;  %4890 = vmatprep.subr.mxu0 %v6448_v36  ;;  %v2642_v3 = vsub.f32 %v6602_v10, %v6619_v30  ;;  %v2636_v22 = vand.u32 4294901760, %v2635_v63  ;;  %v7435_v63 = vld [vmem:[#allocation26_spill] sm:$0xff] }
 0x3d6   : > { %4933 = vmatprep.subr.mxu1 %v2608_v57  ;;  %4891 = vmatpush3.msra.mxu0 %v6448_v36 }
 0x3d7   : > { %4934 = vmatpush3.msra.mxu1 %v2608_v57  ;;  %4892 = vmatprep.subr.mxu0 %v6470_v50  ;;  %v2643_v57 = vand.u32 4294901760, %v2642_v3  ;;  %v7436_v3 = vld [vmem:[#allocation27_spill] sm:$0xff] }
 0x3d8   : > { %4935 = vmatprep.subr.mxu1 %v2615_v8  ;;  %4893 = vmatpush3.msra.mxu0 %v6470_v50 }
 0x3d9   : > { %4936 = vmatpush3.msra.mxu1 %v2615_v8  ;;  %4894 = vmatprep.subr.mxu0 %v6483_v59  ;;  %v2650_v8 = vand.u32 4294901760, %v2649_v51 }
 0x3da   : > { %4937 = vmatprep.subr.mxu1 %v2622_v61  ;;  %4895 = vmatpush3.msra.mxu0 %v6483_v59 }
 0x3db   : > { %4938 = vmatpush3.msra.mxu1 %v2622_v61  ;;  %4896 = vmatprep.subr.mxu0 %v6503_v17  ;;  %v3131_v61 = vld [vmem:[#allocation13 + $0x40] sm:$0xff] }
 0x3dc   : > { %4939 = vmatprep.subr.mxu1 %v2629_v39  ;;  %4897 = vmatpush3.msra.mxu0 %v6503_v17 }
 0x3dd   : > { %4940 = vmatpush3.msra.mxu1 %v2629_v39  ;;  %4898 = vmatprep.subr.mxu0 %v6514_v28  ;;  %v6895_v39 = vand.u32 4294901760, %v3131_v61 }
 0x3de   : > { %4941 = vmatprep.subr.mxu1 %v2636_v22  ;;  %4899 = vmatpush3.msra.mxu0 %v6514_v28 }
 0x3df   : > { %4942 = vmatpush3.msra.mxu1 %v2636_v22  ;;  %4900 = vmatprep.subr.mxu0 %v6528_v29 }
 0x3e0   : > { %4943 = vmatprep.subr.mxu1 %v2643_v57  ;;  %4901 = vmatpush3.msra.mxu0 %v6528_v29 }
 0x3e1   : > { %4944 = vmatpush3.msra.mxu1 %v2643_v57  ;;  %4902 = vmatprep.subr.mxu0 %v6539_v46  ;;  %v3125_v57 = vld [vmem:[#allocation13 + $0x10] sm:$0xff] }
 0x3e2   : > { %4945 = vmatprep.subr.mxu1 %v2650_v8  ;;  %4903 = vmatpush3.msra.mxu0 %v6539_v46 }
 0x3e3   : > { %4946 = vmatpush3.msra.mxu1 %v2650_v8  ;;  %4904 = vmatprep.subr.mxu0 %v6554_v7  ;;  %v7437_v8 = vld [vmem:[#allocation29_spill] sm:$0xff] }
 0x3e4   : > { %4948 = vmatmul.mubr.f32.vlgmr.msra.gmra.mxu1 %v7426_v19  ;;  %4985 = vmatprep.subr.mxu1 %v6382_v53 }
 0x3e5   : > { %4905 = vmatpush3.msra.mxu0 %v6554_v7  ;;  %4986 = vmatpush3.msra.mxu1 %v6382_v53 }
 0x3e6   : > { %5017 = vmatprep.mubr.f32.mxu1 %v6266_v32  ;;  %4906 = vmatprep.subr.mxu0 %v6566_v33  ;;  %v7431_v32 = vld [vmem:[#allocation53_spill] sm:$0xff] }
 0x3e7   : > { %4987 = vmatprep.subr.mxu1 %v6390_v58  ;;  %4907 = vmatpush3.msra.mxu0 %v6566_v33 }
 0x3e8   : > { %4988 = vmatpush3.msra.mxu1 %v6390_v58  ;;  %4908 = vmatprep.subr.mxu0 %v6578_v21 }
 0x3e9   : > { %4989 = vmatprep.subr.mxu1 %v6404_v49  ;;  %4909 = vmatpush3.msra.mxu0 %v6578_v21 }
 0x3ea   : > { %4990 = vmatpush3.msra.mxu1 %v6404_v49  ;;  %4910 = vmatprep.subr.mxu0 %v6591_v48 }
 0x3eb   : > { %4991 = vmatprep.subr.mxu1 %v6415_v16  ;;  %4911 = vmatpush3.msra.mxu0 %v6591_v48 }
 0x3ec   : > { %4992 = vmatpush3.msra.mxu1 %v6415_v16  ;;  %4913 = vmatmul.mubr.f32.vlgmr.msra.gmra.mxu0 %v7431_v32  ;;  %v6913_v32 = vsub.f32 %v3131_v61, %v6895_v39 }
 0x3ed   : > { %4950 = vmatprep.subr.mxu0 %v6399_v11  ;;  %4993 = vmatprep.subr.mxu1 %v6435_v34 }
 0x3ee   : > { %4951 = vmatpush3.msra.mxu0 %v6399_v11  ;;  %4982 = vmatprep.mubr.f32.mxu0 %v6258_v6  ;;  %v3133_v6 = vld [vmem:[#allocation13 + $0x50] sm:$0xff] }
 0x3ef   : > { %4994 = vmatpush3.msra.mxu1 %v6435_v34  ;;  %4952 = vmatprep.subr.mxu0 %v6410_v13 }
 0x3f0   : > { %4995 = vmatprep.subr.mxu1 %v6448_v36  ;;  %4953 = vmatpush3.msra.mxu0 %v6410_v13 }
 0x3f1   : > { %4996 = vmatpush3.msra.mxu1 %v6448_v36  ;;  %4954 = vmatprep.subr.mxu0 %v6427_v15 }
 0x3f2   : > { %4997 = vmatprep.subr.mxu1 %v6470_v50  ;;  %4955 = vmatpush3.msra.mxu0 %v6427_v15 }
 0x3f3   : > { %4998 = vmatpush3.msra.mxu1 %v6470_v50  ;;  %4956 = vmatprep.subr.mxu0 %v6441_v27 }
 0x3f4   : > { %4999 = vmatprep.subr.mxu1 %v6483_v59  ;;  %4957 = vmatpush3.msra.mxu0 %v6441_v27 }
 0x3f5   : > { %5000 = vmatpush3.msra.mxu1 %v6483_v59  ;;  %4958 = vmatprep.subr.mxu0 %v6462_v41 }
 0x3f6   : > { %5001 = vmatprep.subr.mxu1 %v6503_v17  ;;  %4959 = vmatpush3.msra.mxu0 %v6462_v41  ;;  %v3123_v41 = vld [vmem:[#allocation13] sm:$0xff] }
 0x3f7   : > { %5002 = vmatpush3.msra.mxu1 %v6503_v17  ;;  %4960 = vmatprep.subr.mxu0 %v6476_v52 }
 0x3f8   : > { %5003 = vmatprep.subr.mxu1 %v6514_v28  ;;  %4961 = vmatpush3.msra.mxu0 %v6476_v52 }
 0x3f9   : > { %5004 = vmatpush3.msra.mxu1 %v6514_v28  ;;  %4962 = vmatprep.subr.mxu0 %v6496_v44 }
 0x3fa   : > { %5005 = vmatprep.subr.mxu1 %v6528_v29  ;;  %4963 = vmatpush3.msra.mxu0 %v6496_v44  ;;  %v6797_v44 = vand.u32 4294901760, %v3123_v41 }
 0x3fb   : > { %5006 = vmatpush3.msra.mxu1 %v6528_v29  ;;  %4964 = vmatprep.subr.mxu0 %v6508_v25 }
 0x3fc   : > { %5007 = vmatprep.subr.mxu1 %v6539_v46  ;;  %4965 = vmatpush3.msra.mxu0 %v6508_v25 }
 0x3fd   : > { %5008 = vmatpush3.msra.mxu1 %v6539_v46  ;;  %4966 = vmatprep.subr.mxu0 %v6526_v56 }
 0x3fe   : > { %5009 = vmatprep.subr.mxu1 %v6554_v7  ;;  %4967 = vmatpush3.msra.mxu0 %v6526_v56 }
 0x3ff   : > { %5010 = vmatpush3.msra.mxu1 %v6554_v7  ;;  %4968 = vmatprep.subr.mxu0 %v6537_v45 }
 0x400   : > { %5011 = vmatprep.subr.mxu1 %v6566_v33  ;;  %4969 = vmatpush3.msra.mxu0 %v6537_v45 }
 0x401   : > { %5012 = vmatpush3.msra.mxu1 %v6566_v33  ;;  %4970 = vmatprep.subr.mxu0 %v6552_v55 }
 0x402   : > { %5013 = vmatprep.subr.mxu1 %v6578_v21  ;;  %4971 = vmatpush3.msra.mxu0 %v6552_v55 }
 0x403   : > { %5014 = vmatpush3.msra.mxu1 %v6578_v21  ;;  %4972 = vmatprep.subr.mxu0 %v6564_v42 }
 0x404   : > { %5015 = vmatprep.subr.mxu1 %v6591_v48  ;;  %4973 = vmatpush3.msra.mxu0 %v6564_v42 }
 0x405   : > { %5016 = vmatpush3.msra.mxu1 %v6591_v48  ;;  %4974 = vmatprep.subr.mxu0 %v6576_v20 }
 0x406   : > { %5018 = vmatmul.mubr.f32.vlgmr.msra.gmra.mxu1 %v6282_v60  ;;  %5055 = vmatprep.subr.mxu1 %v6382_v53  ;;  %v3130_v60 = vld [vmem:[#allocation13 + $0x38] sm:$0xff] }
 0x407   : > { %4975 = vmatpush3.msra.mxu0 %v6576_v20  ;;  %5056 = vmatpush3.msra.mxu1 %v6382_v53  ;;  %v6745_v53 = vand.u32 4294901760, %v3133_v6  ;;  %v6753_v13 = vand.u32 4294901760, %v3130_v60 }
 0x408   : > { %5087 = vmatprep.mubr.f32.mxu1 %v7421_v43  ;;  %4976 = vmatprep.subr.mxu0 %v6589_v23 }
 0x409   : > { %5057 = vmatprep.subr.mxu1 %v6390_v58  ;;  %4977 = vmatpush3.msra.mxu0 %v6589_v23  ;;  %v6762_v15 = vsub.f32 %v3133_v6, %v6745_v53 }
 0x40a   : > { %5058 = vmatpush3.msra.mxu1 %v6390_v58  ;;  %4978 = vmatprep.subr.mxu0 %v6602_v10  ;;  %v3129_v58 = vld [vmem:[#allocation13 + $0x30] sm:$0xff] }
 0x40b   : > { %5059 = vmatprep.subr.mxu1 %v6404_v49  ;;  %4979 = vmatpush3.msra.mxu0 %v6602_v10 }
 0x40c   : > { %5060 = vmatpush3.msra.mxu1 %v6404_v49  ;;  %4980 = vmatprep.subr.mxu0 %v6612_v0  ;;  %v3127_v49 = vld [vmem:[#allocation13 + $0x20] sm:$0xff] }
 0x40d   : > { %5061 = vmatprep.subr.mxu1 %v6415_v16  ;;  %4981 = vmatpush3.msra.mxu0 %v6612_v0  ;;  %v3134_v0 = vld [vmem:[#allocation13 + $0x58] sm:$0xff] }
 0x40e   : > { %5062 = vmatpush3.msra.mxu1 %v6415_v16  ;;  %4983 = vmatmul.mubr.f32.vlgmr.msra.gmra.mxu0 %v6274_v9  ;;  %v3132_v9 = vld [vmem:[#allocation13 + $0x48] sm:$0xff]  ;;  %v3126_v16 = vld [vmem:[#allocation13 + $0x18] sm:$0xff] }
 0x40f   : > { %5020 = vmatprep.subr.mxu0 %v6421_v24  ;;  %5063 = vmatprep.subr.mxu1 %v6435_v34  ;;  %v6749_v11 = vand.u32 4294901760, %v3132_v9  ;;  %v6771_v27 = vand.u32 4294901760, %v3126_v16 }
 0x410   : > { %5021 = vmatpush3.msra.mxu0 %v6421_v24  ;;  %5052 = vmatprep.mubr.f32.mxu0 %v7421_v43  ;;  %v6757_v24 = vand.u32 4294901760, %v3129_v58 }
 0x411   : > { %5064 = vmatpush3.msra.mxu1 %v6435_v34  ;;  %5022 = vmatprep.subr.mxu0 %v6433_v4  ;;  %v6769_v34 = vsub.f32 %v3132_v9, %v6749_v11  ;;  %v6795_v43 = vsub.f32 %v3126_v16, %v6771_v27  ;;  %v6921_v9 = vand.u32 4294901760, %v3125_v57 }
 0x412   : > { %5065 = vmatprep.subr.mxu1 %v6448_v36  ;;  %5023 = vmatpush3.msra.mxu0 %v6433_v4  ;;  %v6764_v4 = vand.u32 4294901760, %v3127_v49 }
 0x413   : > { %5066 = vmatpush3.msra.mxu1 %v6448_v36  ;;  %5024 = vmatprep.subr.mxu0 %v6454_v26  ;;  %v3124_v36 = vld [vmem:[#allocation13 + $0x8] sm:$0xff] }
 0x414   : > { %5067 = vmatprep.subr.mxu1 %v6470_v50  ;;  %5025 = vmatpush3.msra.mxu0 %v6454_v26  ;;  %v6776_v26 = vsub.f32 %v3130_v60, %v6753_v13  ;;  %v6787_v52 = vsub.f32 %v3127_v49, %v6764_v4  ;;  %v3880_v49 = vsub.f32 %v3125_v57, %v6921_v9 }
 0x415   : > { %5068 = vmatpush3.msra.mxu1 %v6470_v50  ;;  %5026 = vmatprep.subr.mxu0 %v6468_v47  ;;  %v3273_v50 = vand.u32 4294901760, %v6762_v15 }
 0x416   : > { %5069 = vmatprep.subr.mxu1 %v6483_v59  ;;  %5027 = vmatpush3.msra.mxu0 %v6468_v47  ;;  %v6781_v47 = vsub.f32 %v3129_v58, %v6757_v24  ;;  %v6933_v58 = vand.u32 4294901760, %v6913_v32 }
 0x417   : > { %5070 = vmatpush3.msra.mxu1 %v6483_v59  ;;  %5028 = vmatprep.subr.mxu0 %v6488_v62  ;;  %v6789_v59 = vand.u32 4294901760, %v3124_v36  ;;  %v3274_v25 = vsub.f32 %v6762_v15, %v3273_v50 }
 0x418   : > { %5071 = vmatprep.subr.mxu1 %v6503_v17  ;;  %5029 = vmatpush3.msra.mxu0 %v6488_v62  ;;  %v3279_v62 = vand.u32 4294901760, %v6769_v34 }
 0x419   : > { %5072 = vmatpush3.msra.mxu1 %v6503_v17  ;;  %5030 = vmatprep.subr.mxu0 %v6501_v14  ;;  %v3291_v17 = vand.u32 4294901760, %v6781_v47 }
 0x41a   : > { %5073 = vmatprep.subr.mxu1 %v6514_v28  ;;  %5031 = vmatpush3.msra.mxu0 %v6501_v14  ;;  %v3285_v14 = vand.u32 4294901760, %v6776_v26  ;;  %v3280_v56 = vsub.f32 %v6769_v34, %v3279_v62 }
 0x41b   : > { %5074 = vmatpush3.msra.mxu1 %v6514_v28  ;;  %5032 = vmatprep.subr.mxu0 %v6518_v31  ;;  %v3297_v28 = vand.u32 4294901760, %v6787_v52 }
 0x41c   : > { %5075 = vmatprep.subr.mxu1 %v6528_v29  ;;  %5033 = vmatpush3.msra.mxu0 %v6518_v31  ;;  %v6812_v31 = vsub.f32 %v3124_v36, %v6789_v59  ;;  %v3286_v45 = vsub.f32 %v6776_v26, %v3285_v14 }
 0x41d   : > { %5076 = vmatpush3.msra.mxu1 %v6528_v29  ;;  %5034 = vmatprep.subr.mxu0 %v6533_v40  ;;  %v3303_v29 = vand.u32 4294901760, %v6795_v43  ;;  %v3298_v55 = vsub.f32 %v6787_v52, %v3297_v28 }
 0x41e   : > { %5077 = vmatprep.subr.mxu1 %v6539_v46  ;;  %5035 = vmatpush3.msra.mxu0 %v6533_v40  ;;  %v6821_v40 = vsub.f32 %v3123_v41, %v6797_v44  ;;  %v7440_v41 = vld [vmem:[#allocation23_spill] sm:$0xff] }
 0x41f   : > { %5078 = vmatpush3.msra.mxu1 %v6539_v46  ;;  %5036 = vmatprep.subr.mxu0 %v6549_v35  ;;  %v3292_v46 = vsub.f32 %v6781_v47, %v3291_v17  ;;  %v3304_v42 = vsub.f32 %v6795_v43, %v3303_v29 }
 0x420   : > { %5079 = vmatprep.subr.mxu1 %v6554_v7  ;;  %5037 = vmatpush3.msra.mxu0 %v6549_v35  ;;  %v3275_v35 = vand.u32 4294901760, %v3274_v25 }
 0x421   : > { %5080 = vmatpush3.msra.mxu1 %v6554_v7  ;;  %5038 = vmatprep.subr.mxu0 %v6561_v2  ;;  %v3309_v7 = vand.u32 4294901760, %v6812_v31  ;;  %v3293_v20 = vand.u32 4294901760, %v3292_v46  ;;  %v3305_v23 = vand.u32 4294901760, %v3304_v42 }
 0x422   : > { %5081 = vmatprep.subr.mxu1 %v6566_v33  ;;  %5039 = vmatpush3.msra.mxu0 %v6561_v2  ;;  %v3281_v2 = vand.u32 4294901760, %v3280_v56 }
 0x423   : > { %5082 = vmatpush3.msra.mxu1 %v6566_v33  ;;  %5040 = vmatprep.subr.mxu0 %v6573_v18  ;;  %v3315_v33 = vand.u32 4294901760, %v6821_v40 }
 0x424   : > { %5083 = vmatprep.subr.mxu1 %v6578_v21  ;;  %5041 = vmatpush3.msra.mxu0 %v6573_v18  ;;  %v3287_v18 = vand.u32 4294901760, %v3286_v45 }
 0x425   : > { %5084 = vmatpush3.msra.mxu1 %v6578_v21  ;;  %5042 = vmatprep.subr.mxu0 %v6586_v5  ;;  %v3299_v21 = vand.u32 4294901760, %v3298_v55 }
 0x426   : > { %5085 = vmatprep.subr.mxu1 %v6591_v48  ;;  %5043 = vmatpush3.msra.mxu0 %v6586_v5  ;;  %v3310_v5 = vsub.f32 %v6812_v31, %v3309_v7 }
 0x427   : > { %5086 = vmatpush3.msra.mxu1 %v6591_v48  ;;  %5044 = vmatprep.subr.mxu0 %v6599_v37  ;;  %v3316_v48 = vsub.f32 %v6821_v40, %v3315_v33 }
 0x428   : > { %5088 = vmatmul.mubr.f32.vlgmr.msra.gmra.mxu1 %v7426_v19  ;;  %5045 = vmatpush3.msra.mxu0 %v6599_v37  ;;  %v3311_v37 = vand.u32 4294901760, %v3310_v5 }
 0x429   : > { %5046 = vmatprep.subr.mxu0 %v6609_v54  ;;  %3276 = vmatprep.subr.mxu1 %v3275_v35  ;;  %v3317_v10 = vand.u32 4294901760, %v3316_v48 }
 0x42a   : > { %5047 = vmatpush3.msra.mxu0 %v6609_v54  ;;  %3282 = vmatpush1.msra.mxu1 %v3281_v2  ;;  %v7432_v54 = vld [vmem:[#allocation25_spill] sm:$0xff] }
 0x42b   : > { %5048 = vmatprep.subr.mxu0 %v6619_v30  ;;  %3288 = vmatprep.subr.mxu1 %v3287_v18 }
 0x42c   : > { %5049 = vmatpush3.msra.mxu0 %v6619_v30  ;;  %3294 = vmatpush1.msra.mxu1 %v3293_v20  ;;  %v6887_v30 = vand.u32 4294901760, %v3134_v0 }
 0x42d   : > { %5050 = vmatprep.subr.mxu0 %v6626_v38  ;;  %3300 = vmatprep.subr.mxu1 %v3299_v21 }
 0x42e   : > { %5051 = vmatpush3.msra.mxu0 %v6626_v38  ;;  %3306 = vmatpush1.msra.mxu1 %v3305_v23  ;;  %v3128_v38 = vld [vmem:[#allocation13 + $0x28] sm:$0xff]  ;;  %v6900_v22 = vsub.f32 %v3134_v0, %v6887_v30 }
 0x42f   : > { %5053 = vmatmul.mubr.f32.vlgmr.msra.gmra.mxu0 %v7426_v19  ;;  %3177 = vmatprep.subr.mxu0 %v6745_v53  ;;  %v7433_v19 = vld [vmem:[#allocation31_spill] sm:$0xff]  ;;  %v6904_v51 = vand.u32 4294901760, %v3128_v38 }
 0x430   : > { %3179 = vmatpush1.msra.mxu0 %v6749_v11  ;;  %3224 = vmatprep.mubr.f32.mxu0 %v7390_v1  ;;  %v6919_v6 = vand.u32 4294901760, %v6900_v22 }
 0x431   : > { %3181 = vmatprep.subr.mxu0 %v6753_v13  ;;  %3312 = vmatprep.subr.mxu1 %v3311_v37  ;;  %v3873_v60 = vsub.f32 %v3128_v38, %v6904_v51 }
 0x432   : > { %3183 = vmatpush1.msra.mxu0 %v6757_v24  ;;  %3318 = vmatpush1.msra.mxu1 %v3317_v10 }
 0x433   : > { %3185 = vmatprep.subr.mxu0 %v6764_v4  ;;  %3351 = vmatprep.mubr.f32.mxu1 %v7390_v1  ;;  %v6943_v16 = vand.u32 4294901760, %v3873_v60 }
 0x434   : > { %3187 = vmatpush1.msra.mxu0 %v6771_v27  ;;  %3353 = vmatmul.mubr.f32.vlgmr.msra.gmra.mxu1 %v7432_v54 }
 0x435   : > { %3189 = vmatprep.subr.mxu0 %v6789_v59  ;;  %3488 = vmatprep.subr.mxu1 %v6745_v53 }
 0x436   : > { %3191 = vmatpush1.msra.mxu0 %v6797_v44  ;;  %3490 = vmatpush1.msra.mxu1 %v6749_v11 }
 0x437   : > { %3230 = vmatmul.mubr.f32.vlgmr.msra.gmra.mxu0 %v7433_v19  ;;  %3392 = vmatprep.subr.mxu0 %v6762_v15 }
 0x438   : > { %3395 = vmatpush1.msra.mxu0 %v6769_v34  ;;  %3235 = vmatprep.mubr.f32.mxu0 %v7390_v1  ;;  %v3875_v34 = vsub.f32 %v3873_v60, %v6943_v16 }
 0x439   : > { %3398 = vmatprep.subr.mxu0 %v6776_v26  ;;  %3492 = vmatprep.subr.mxu1 %v6753_v13 }
 0x43a   : > { %3401 = vmatpush1.msra.mxu0 %v6781_v47  ;;  %3358 = vmatprep.mubr.f32.mxu1 %v7390_v1  ;;  %v3876_v26 = vand.u32 4294901760, %v3875_v34  ;;  %v7441_v47 = vld [vmem:[#allocation24_spill] sm:$0xff] }
 0x43b   : > { %3241 = vmatmul.mubr.f32.gmra.mxu0 %v7434_v12  ;;  %3404 = vmatprep.subr.mxu0 %v6787_v52 }
 0x43c   : > { %3494 = vmatpush1.msra.mxu1 %v6757_v24  ;;  %3407 = vmatpush1.msra.mxu0 %v6795_v43 }
 0x43d   : > { %3360 = vmatmul.mubr.f32.gmra.mxu1 %v7435_v63  ;;  %3496 = vmatprep.subr.mxu1 %v6764_v4 }
 0x43e   : > { %3410 = vmatprep.subr.mxu0 %v6812_v31  ;;  %3498 = vmatpush1.msra.mxu1 %v6771_v27 }
 0x43f   : > { %3413 = vmatpush1.msra.mxu0 %v6821_v40  ;;  %3446 = vmatprep.mubr.f32.mxu0 %v7390_v1 }
 0x440   : > { %3500 = vmatprep.subr.mxu1 %v6789_v59  ;;  %3449 = vmatmul.mubr.f32.vlgmr.msra.gmra.mxu0 %v7436_v3 }
 0x441   : > { %3502 = vmatpush1.msra.mxu1 %v6797_v44  ;;  %3535 = vmatprep.mubr.f32.mxu1 %v7390_v1 }
 0x442   : > { %3581 = vmatprep.subr.mxu0 %v3273_v50  ;;  %3539 = vmatmul.mubr.f32.vlgmr.msra.gmra.mxu1 %v7437_v8  ;;  %v7016_v50 = vpop.f32.mrf.mxu1  ;;  %v1638_v52 = vpop.f32.mrf.mxu0 }
 0x443   : > { %3585 = vmatpush1.msra.mxu0 %v3279_v62  ;;  %3682 = vmatprep.subr.mxu1 %v6745_v53  ;;  %v7438_v53 = vld [vmem:[#allocation28_spill] sm:$0xff] }
 0x444   : > { %3589 = vmatprep.subr.mxu0 %v3285_v14  ;;  %3684 = vmatpush1.msra.mxu1 %v6749_v11  ;;  %v3861_v11 = vsub.f32 %v6900_v22, %v6919_v6  ;;  %v7020_v62 = vpop.f32.mrf.mxu0 }
 0x445   : > { %3454 = vmatprep.mubr.f32.mxu0 %v7390_v1  ;;  %3593 = vmatpush1.msra.mxu0 %v3291_v17 }
 0x446   : > { %3686 = vmatprep.subr.mxu1 %v6753_v13  ;;  %3457 = vmatmul.mubr.f32.gmra.mxu0 %v7438_v53  ;;  %v7439_v13 = vld [vmem:[#allocation30_spill] sm:$0xff]  ;;  %v3862_v15 = vand.u32 4294901760, %v3861_v11 }
 0x447   : > { %3544 = vmatprep.mubr.f32.mxu1 %v7390_v1  ;;  %3597 = vmatprep.subr.mxu0 %v3297_v28 }
 0x448   : > { %3688 = vmatpush1.msra.mxu1 %v6757_v24  ;;  %3601 = vmatpush1.msra.mxu0 %v3303_v29  ;;  %v3868_v24 = vsub.f32 %v6913_v32, %v6933_v58 }
 0x449   : > { %3548 = vmatmul.mubr.f32.gmra.mxu1 %v7439_v13  ;;  %3690 = vmatprep.subr.mxu1 %v6764_v4  ;;  %v6955_v4 = vand.u32 4294901760, %v3880_v49 }
 0x44a   : > { %3605 = vmatprep.subr.mxu0 %v3309_v7  ;;  %3692 = vmatpush1.msra.mxu1 %v6771_v27  ;;  %v3869_v27 = vand.u32 4294901760, %v3868_v24 }
 0x44b   : > { %3609 = vmatpush1.msra.mxu0 %v3315_v33  ;;  %3642 = vmatprep.mubr.f32.mxu0 %v7390_v1  ;;  %v3882_v36 = vsub.f32 %v3880_v49, %v6955_v4 }
 0x44c   : > { %3694 = vmatprep.subr.mxu1 %v6789_v59  ;;  %3644 = vmatmul.mubr.f32.vlgmr.msra.gmra.mxu0 %v7432_v54  ;;  %v7018_v59 = vpop.f32.mrf.mxu1 }
 0x44d   : > { %3696 = vmatpush1.msra.mxu1 %v6797_v44  ;;  %3729 = vmatprep.mubr.f32.mxu1 %v7390_v1  ;;  %v1649_v44 = vpop.f32.mrf.mxu0 }
 0x44e   : > { %3731 = vmatmul.mubr.f32.vlgmr.msra.gmra.mxu1 %v7432_v54  ;;  %3649 = vmatprep.mubr.f32.mxu0 %v7390_v1  ;;  %v7022_v43 = vpop.f32.mrf.mxu1 }
 0x44f   : > { %3736 = vmatprep.mubr.f32.mxu1 %v7390_v1  ;;  %5090 = vmatprep.subr.mxu0 %v6887_v30  ;;  %v3883_v1 = vand.u32 4294901760, %v3882_v36  ;;  %v7026_v17 = vpop.f32.mrf.mxu0 }
 0x450   : > { %3651 = vmatmul.mubr.f32.gmra.mxu0 %v7435_v63  ;;  %5101 = vmatprep.subr.mxu1 %v3862_v15  ;;  %v7024_v14 = vpop.f32.mrf.mxu1 }
 0x451   : > { %5091 = vmatpush3.msra.mxu0 %v6887_v30  ;;  %5102 = vmatpush3.msra.mxu1 %v3862_v15 }
 0x452   : > { %3738 = vmatmul.mubr.f32.gmra.mxu1 %v7435_v63  ;;  %5092 = vmatprep.subr.mxu0 %v6895_v39 }
 0x453   : > { %5093 = vmatpush3.msra.mxu0 %v6895_v39  ;;  %5103 = vmatprep.subr.mxu1 %v3869_v27 }
 0x454   : > { %5094 = vmatprep.subr.mxu0 %v6904_v51  ;;  %5104 = vmatpush3.msra.mxu1 %v3869_v27 }
 0x455   : > { %5095 = vmatpush3.msra.mxu0 %v6904_v51  ;;  %5105 = vmatprep.subr.mxu1 %v3876_v26 }
 0x456   : > { %5096 = vmatprep.subr.mxu0 %v6921_v9  ;;  %5106 = vmatpush3.msra.mxu1 %v3876_v26 }
 0x457   : > { %5097 = vmatpush3.msra.mxu0 %v6921_v9  ;;  %5098 = vmatprep.mubr.f32.mxu0 %v7433_v19 }
 0x458   : > { %5107 = vmatprep.subr.mxu1 %v3883_v1  ;;  %5112 = vmatprep.subr.mxu0 %v6900_v22 }
 0x459   : > { %5099 = vmatmul.mubr.f32.vlgmr.msra.gmra.mxu0 %v7434_v12  ;;  %5108 = vmatpush3.msra.mxu1 %v3883_v1 }
 0x45a   : > { %5113 = vmatpush3.msra.mxu0 %v6900_v22  ;;  %5109 = vmatprep.mubr.f32.mxu1 %v7432_v54 }
 0x45b   : > { %5114 = vmatprep.subr.mxu0 %v6913_v32  ;;  %5123 = vmatprep.subr.mxu1 %v6887_v30  ;;  %v7028_v25 = vpop.f32.mrf.mxu1 }
 0x45c   : > { %5110 = vmatmul.mubr.f32.vlgmr.msra.gmra.mxu1 %v7435_v63  ;;  %5115 = vmatpush3.msra.mxu0 %v6913_v32  ;;  %v7105_v32 = vld [vmem:[%s7229_s9] sm:$0x7] }
 0x45d   : > { %5124 = vmatpush3.msra.mxu1 %v6887_v30  ;;  %5116 = vmatprep.subr.mxu0 %v3873_v60  ;;  %v7035_v31 = vpop.f32.mrf.mxu1 }
 0x45e   : > { %5125 = vmatprep.subr.mxu1 %v6895_v39  ;;  %5117 = vmatpush3.msra.mxu0 %v3873_v60 }
 0x45f   : > { %5126 = vmatpush3.msra.mxu1 %v6895_v39  ;;  %5118 = vmatprep.subr.mxu0 %v3880_v49 }
 0x460   : > { %5127 = vmatprep.subr.mxu1 %v6904_v51  ;;  %5119 = vmatpush3.msra.mxu0 %v3880_v49  ;;  %v7045_v29 = vpop.f32.mrf.mxu1 }
 0x461   : > { %5128 = vmatpush3.msra.mxu1 %v6904_v51  ;;  %5120 = vmatprep.mubr.f32.mxu0 %v7436_v3 }
 0x462   : > { %5129 = vmatprep.subr.mxu1 %v6921_v9  ;;  %5134 = vmatprep.subr.mxu0 %v6919_v6  ;;  %v7049_v45 = vpop.f32.mrf.mxu1 }
 0x463   : > { %5121 = vmatmul.mubr.f32.vlgmr.msra.gmra.mxu0 %v7438_v53  ;;  %5130 = vmatpush3.msra.mxu1 %v6921_v9 }
 0x464   : > { %5135 = vmatpush3.msra.mxu0 %v6919_v6  ;;  %5131 = vmatprep.mubr.f32.mxu1 %v7437_v8 }
 0x465   : > { %5136 = vmatprep.subr.mxu0 %v6933_v58  ;;  %5145 = vmatprep.subr.mxu1 %v6887_v30  ;;  %v7031_v28 = vpop.f32.mrf.mxu0 }
 0x466   : > { %5132 = vmatmul.mubr.f32.vlgmr.msra.gmra.mxu1 %v7439_v13  ;;  %5137 = vmatpush3.msra.mxu0 %v6933_v58 }
 0x467   : > { %5146 = vmatpush3.msra.mxu1 %v6887_v30  ;;  %5138 = vmatprep.subr.mxu0 %v6943_v16  ;;  %v7040_v56 = vpop.f32.mrf.mxu0  ;;  %v7445_v30 = vlaneseq }
 0x468   : > { %5147 = vmatprep.subr.mxu1 %v6895_v39  ;;  %5139 = vmatpush3.msra.mxu0 %v6943_v16 }
 0x469   : > { %5148 = vmatpush3.msra.mxu1 %v6895_v39  ;;  %5140 = vmatprep.subr.mxu0 %v6955_v4  ;;  %v7090_v61 = vshrl.u32 %v7445_v30, 7 }
 0x46a   : > { %5149 = vmatprep.subr.mxu1 %v6904_v51  ;;  %5141 = vmatpush3.msra.mxu0 %v6955_v4  ;;  %v2033_v40 = vpop.f32.mrf.mxu0 }
 0x46b   : > { %5142 = vmatprep.mubr.f32.mxu0 %v7432_v54  ;;  %5150 = vmatpush3.msra.mxu1 %v6904_v51  ;;  %v1522_v3 = vsub.s32 0, %v7090_v61  ;;  %v7100_v51 = vld [vmem:[%s7227_s7] sm:$0x7]  ;;  %v1526_v60 = vsub.s32 1, %v7090_v61 }
 0x46c   : > { %5143 = vmatmul.mubr.f32.vlgmr.msra.gmra.mxu0 %v7435_v63  ;;  %5151 = vmatprep.subr.mxu1 %v6921_v9  ;;  %v7051_v46 = vpop.f32.mrf.mxu0 }
 0x46d   : > { %5152 = vmatpush3.msra.mxu1 %v6921_v9  ;;  %5153 = vmatprep.mubr.f32.mxu1 %v7432_v54  ;;  %v1523_v6 = vrot.slane %v7100_v51, %v1522_v3  ;;  %v3140_v53 = vrot.slane %v7105_v32, %v1522_v3  ;;  %v3144_v13 = vrot.slane %v7105_v32, %v1526_v60 }
 0x46e   : > { %5154 = vmatmul.mubr.f32.vlgmr.msra.gmra.mxu1 %v7435_v63  ;;  %4306 = vrot.lane.b32.xlu0 %v7440_v41, %s5546_s15  ;;  %v1527_v24 = vrot.slane %v7100_v51, %v1526_v60 }
 0x46f   : > { %4308 = vrot.lane.b32.xlu1 %v7441_v47, %s5546_s15  ;;  %v1639_v49 = vadd.f32 %v1638_v52, %v1523_v6  ;;  %v1650_v34 = vadd.f32 %v1649_v44, %v1523_v6  ;;  %s4344_s15 = sadd.s32 (!%p4568_p11), %s4569_s11, %s7043_s12 }
 0x470   : > { %v1641_v30 = vadd.f32 %v7020_v62, %v1527_v24  ;;  %v1652_v44 = vadd.f32 %v7026_v17, %v1527_v24  ;;  %s4570_s30 = sshll.u32 (!%p4568_p11), %s4344_s15, 3 }
 0x471   : > { %v1882_v26 = vadd.f32 %v7016_v50, %v1639_v49  ;;  %s4346_s13 = scalar_lea.vmem (!%p4568_p11), [#allocation2], %s4570_s30 }
 0x473   : > { %v2026_v3 = vadd.f32 %v7031_v28, %v1882_v26 }
 0x47f   : > { %v7053_v35 = vpop.f32.mrf.mxu1 }
 0x481   : > { %v7057_v7 = vpop.f32.mrf.mxu1 }
 0x484   : > { %v7061_v42 = vpop.f32.mrf.mxu1 }
 0x486   : > { %v7065_v18 = vpop.f32.mrf.mxu1 }
 0x489   : > { %v7055_v55 = vpop.f32.mrf.mxu0 }
 0x48b   : > { %v7059_v2 = vpop.f32.mrf.mxu0 }
 0x48e   : > { %v7063_v33 = vpop.f32.mrf.mxu0 }
 0x490   : > { %v7067_v20 = vpop.f32.mrf.mxu0 }
 0x4a4   : > { %v7069_v21 = vpop.f32.mrf.mxu1 }
 0x4a6   : > { %v7073_v23 = vpop.f32.mrf.mxu1 }
 0x4ac   : > { %v7071_v5 = vpop.f32.mrf.mxu0 }
 0x4ae   : > { %v7075_v48 = vpop.f32.mrf.mxu0 }
 0x4c6   : > { %v7077_v37 = vpop.f32.mrf.mxu1 }
 0x4c7   : > { %7442 = vst [vmem:[#allocation33_spill] sm:$0xff] %v7077_v37 }
 0x4c8   : > { %v7081_v54 = vpop.f32.mrf.mxu1 }
 0x4ce   : > { %v7079_v10 = vpop.f32.mrf.mxu0 }
 0x4d0   : > { %v7083_v19 = vpop.f32.mrf.mxu0 }
 0x4e8   : > { %v7085_v0 = vpop.f32.mrf.mxu1 }
 0x4e9   : > { %7443 = vst [vmem:[#allocation40_spill] sm:$0xff] %v7085_v0  ;;  %v1889_v0 = vadd.f32 %v7022_v43, %v1650_v34 }
 0x4ea   : > { %v7092_v63 = vpop.f32.mrf.mxu1 }
 0x4eb   : > { %7446 = vst [vmem:[#allocation35_spill] sm:$0xff] %v7092_v63  ;;  %v2034_v6 = vadd.f32 %v2033_v40, %v1889_v0 }
 0x4ed   : > { %v2149_v17 = vadd.f32 %v7045_v29, %v2034_v6 }
 0x4ef   : > { %v7087_v12 = vpop.f32.mrf.mxu0 }
 0x4f0   : > { %7444 = vst [vmem:[#allocation34_spill] sm:$0xff] %v7087_v12 }
 0x4f1   : > { %v7094_v38 = vpop.f32.mrf.mxu0 }
 0x4f4   : > { %v3354_v39 = vpop.f32.mrf.mxu1 }
 0x4f6   : > { %v3356_v8 = vpop.f32.mrf.mxu1 }
 0x4f7   : > { %v3231_v22 = vpop.f32.mrf.mxu0 }
 0x4f8   : > { %v3232_v4 = vadd.f32 %v3231_v22, %v3140_v53  ;;  %v1884_v22 = vadd.f32 %v7018_v59, %v1641_v30 }
 0x4f9   : > { %v3233_v57 = vpop.f32.mrf.mxu0 }
 0x4fa   : > { %v3234_v1 = vadd.f32 %v3233_v57, %v3144_v13  ;;  %v3355_v47 = vadd.f32 %v3354_v39, %v3232_v4  ;;  %v2140_v57 = vadd.f32 %v7028_v25, %v2026_v3  ;;  %v2028_v39 = vadd.f32 %v7040_v56, %v1884_v22 }
 0x4fb   : > { %v3242_v9 = vpop.f32.mrf.mxu0  ;;  %v2324_v56 = vadd.f32 %v7063_v33, %v2149_v17 }
 0x4fc   : > { %v3243_v41 = vadd.f32 %v3242_v9, %v3140_v53  ;;  %v3357_v12 = vadd.f32 %v3356_v8, %v3234_v1  ;;  %v2317_v9 = vadd.f32 %v7055_v55, %v2140_v57  ;;  %v2142_v25 = vadd.f32 %v7035_v31, %v2028_v39 }
 0x4fd   : > { %v3361_v58 = vpop.f32.mrf.mxu1  ;;  %v3244_v11 = vpop.f32.mrf.mxu0 }
 0x4fe   : > { %v3245_v60 = vadd.f32 %v3244_v11, %v3144_v13  ;;  %v3362_v62 = vadd.f32 %v3361_v58, %v3243_v41  ;;  %v2319_v29 = vadd.f32 %v7059_v2, %v2142_v25 }
 0x4ff   : > { %v3363_v16 = vpop.f32.mrf.mxu1 }
 0x500   : > { %v3450_v15 = vpop.f32.mrf.mxu0  ;;  %v3364_v43 = vadd.f32 %v3363_v16, %v3245_v60  ;;  %v2430_v3 = vadd.f32 %v7057_v7, %v2319_v29 }
 0x501   : > { %v3451_v37 = vadd.f32 %v3450_v15, %v3355_v47  ;;  %v1891_v47 = vadd.f32 %v7024_v14, %v1652_v44 }
 0x502   : > { %v3540_v27 = vpop.f32.mrf.mxu1  ;;  %v3452_v36 = vpop.f32.mrf.mxu0 }
 0x503   : > { %v3453_v49 = vadd.f32 %v3452_v36, %v3357_v12  ;;  %v3541_v53 = vadd.f32 %v3540_v27, %v3451_v37  ;;  %v2036_v41 = vadd.f32 %v7051_v46, %v1891_v47  ;;  %v2428_v37 = vadd.f32 %v7053_v35, %v2317_v9 }
 0x504   : > { %v3542_v52 = vpop.f32.mrf.mxu1  ;;  %v2435_v46 = vadd.f32 %v7061_v42, %v2324_v56 }
 0x505   : > { %v3543_v40 = vadd.f32 %v3542_v52, %v3453_v49  ;;  %v2151_v31 = vadd.f32 %v7049_v45, %v2036_v41  ;;  %v1530_v45 = vsub.s32 2, %v7090_v61 }
 0x506   : > { %v3458_v63 = vpop.f32.mrf.mxu0 }
 0x507   : > { %v3459_v8 = vadd.f32 %v3458_v63, %v3362_v62  ;;  %v2326_v30 = vadd.f32 %v7067_v20, %v2151_v31  ;;  %v3148_v62 = vrot.slane %v7105_v32, %v1530_v45  ;;  %v1531_v9 = vrot.slane %v7100_v51, %v1530_v45  ;;  %v4309_v45 = vpop.permute.xlu1 %4308 }
 0x508   : > { %v3460_v50 = vpop.f32.mrf.mxu0 }
 0x509   : > { %v3549_v28 = vpop.f32.mrf.mxu1  ;;  %v3461_v0 = vadd.f32 %v3460_v50, %v3364_v43  ;;  %v2437_v42 = vadd.f32 %v7065_v18, %v2326_v30  ;;  %v2527_v18 = vadd.f32 %v7075_v48, %v1531_v9 }
 0x50a   : > { %v3550_v63 = vadd.f32 %v3549_v28, %v3459_v8 }
 0x50b   : > { %v3551_v11 = vpop.f32.mrf.mxu1 }
 0x50c   : > { %v3645_v59 = vpop.f32.mrf.mxu0  ;;  %v3552_v15 = vadd.f32 %v3551_v11, %v3461_v0  ;;  %v2688_v0 = vadd.f32 %v7073_v23, %v2527_v18 }
 0x50d   : > { %v3646_v13 = vadd.f32 %v3645_v59, %v3541_v53 }
 0x50e   : > { %v3732_v12 = vpop.f32.mrf.mxu1  ;;  %v3647_v55 = vpop.f32.mrf.mxu0  ;;  %v2798_v25 = vadd.f32 %v7083_v19, %v2688_v0 }
 0x50f   : > { %v3733_v58 = vadd.f32 %v3732_v12, %v3646_v13  ;;  %v3648_v16 = vadd.f32 %v3647_v55, %v3543_v40  ;;  %v2537_v40 = vadd.f32 %v7071_v5, %v1531_v9 }
 0x510   : > { %v3734_v14 = vpop.f32.mrf.mxu1  ;;  %v3652_v24 = vpop.f32.mrf.mxu0 }
 0x511   : > { %v4272_v4 = vadd.f32 %v3733_v58, %v2428_v37  ;;  %v3653_v34 = vadd.f32 %v3652_v24, %v3550_v63  ;;  %v3735_v26 = vadd.f32 %v3734_v14, %v3648_v16  ;;  %v2694_v48 = vadd.f32 %v7069_v21, %v2537_v40 }
 0x512   : > { %v3739_v27 = vpop.f32.mrf.mxu1  ;;  %v3654_v33 = vpop.f32.mrf.mxu0  ;;  %v2894_v58 = vadd.f32 %v7081_v54, %v2798_v25 }
 0x513   : > { %v4560_v36 = vmul.f32 -1.442695, %v4272_v4  ;;  %v3740_v1 = vadd.f32 %v3739_v27, %v3653_v34  ;;  %v3655_v35 = vadd.f32 %v3654_v33, %v3552_v15  ;;  %v4286_v44 = vadd.f32 %v3735_v26, %v2430_v3  ;;  %v7447_v4 = vld [vmem:[#allocation33_spill] sm:$0xff]  ;;  %v7448_v33 = vld [vmem:[#allocation34_spill] sm:$0xff] }
 0x514   : > { %v3741_v2 = vpop.f32.mrf.mxu1  ;;  %v2805_v63 = vadd.f32 %v7079_v10, %v2694_v48  ;;  %v3021_v24 = vadd.f32 %v7094_v38, %v2894_v58  ;;  %v7449_v10 = vld [vmem:[#allocation35_spill] sm:$0xff]  ;;  %v7450_v38 = vld [vmem:[#allocation40_spill] sm:$0xff] }
 0x515   : > { %5283 = vpow2.f32 %v4560_v36  ;;  %v4273_v52 = vadd.f32 %v3740_v1, %v2435_v46  ;;  %v3742_v60 = vadd.f32 %v3741_v2, %v3655_v35  ;;  %v4562_v57 = vmul.f32 -1.442695, %v4286_v44  ;;  %v7451_v44 = vld [vmem:[#allocation23_spill] sm:$0xff] }
 0x516   : > { %v2902_v34 = vadd.f32 %v7447_v4, %v2805_v63  ;;  %v3114_v26 = vadd.f32 %v7449_v10, %v3021_v24 }
 0x517   : > { %v4561_v22 = vmul.f32 -1.442695, %v4273_v52  ;;  %v4287_v50 = vadd.f32 %v3742_v60, %v2437_v42  ;;  %v4307_v60 = vpop.permute.xlu0 %4306 }
 0x518   : > { %v3027_v36 = vadd.f32 %v7448_v33, %v2902_v34 }
 0x519   : > { %5285 = vpow2.f32 %v4561_v22  ;;  %v5100_v6 = vpop.f32.mrf.mxu0  ;;  %v4563_v28 = vmul.f32 -1.442695, %v4287_v50  ;;  %v4312_v22 = vsel %vm903_vm3, %v7451_v44, %v4307_v60 }
 0x51a   : > { %5287 = vpow2.f32 %v4562_v57  ;;  %v3830_v43 = vadd.f32 %v5100_v6, %v3148_v62  ;;  %v3120_v3 = vadd.f32 %v7450_v38, %v3027_v36  ;;  %v4315_v6 = vsel %vm4314_vm5, %v4312_v22, 0.0 }
 0x51b   : > { %v3819_v49 = vpop.f32.mrf.mxu0  ;;  %5289 = vpow2.f32 %v4563_v28 }
 0x51c   : > { %v5111_v20 = vpop.f32.mrf.mxu1  ;;  %v3820_v7 = vadd.f32 %v3819_v49, %v3148_v62  ;;  %v7452_v62 = vld [vmem:[#allocation24_spill] sm:$0xff] }
 0x51d   : > { %v3927_v47 = vadd.f32 %v5111_v20, %v3830_v43  ;;  %v4313_v49 = vsel %vm903_vm3, %v7452_v62, %v4309_v45 }
 0x51e   : > { %v3920_v39 = vpop.f32.mrf.mxu1 }
 0x51f   : > { %v3921_v8 = vadd.f32 %v3920_v39, %v3820_v7  ;;  %v4316_v39 = vsel %vm4314_vm5, %v4313_v49, 0.0 }
 0x522   : > { %v5284_v53 = vpop.eup %5283 }
 0x523   : > { %v4280_v61 = vadd.f32 1.0, %v5284_v53  ;;  %v5122_v11 = vpop.f32.mrf.mxu0 }
 0x524   : > { %v4014_v56 = vadd.f32 %v5122_v11, %v3927_v47 }
 0x525   : > { %5291 = vrcp.f32 %v4280_v61  ;;  %v4006_v17 = vpop.f32.mrf.mxu0 }
 0x526   : > { %v5286_v32 = vpop.eup %5285  ;;  %v5133_v59 = vpop.f32.mrf.mxu1  ;;  %v4007_v41 = vadd.f32 %v4006_v17, %v3921_v8 }
 0x527   : > { %v4281_v13 = vadd.f32 1.0, %v5286_v32  ;;  %v5288_v55 = vpop.eup %5287  ;;  %v4099_v16 = vadd.f32 %v5133_v59, %v4014_v56 }
 0x528   : > { %v4090_v51 = vpop.f32.mrf.mxu1  ;;  %v5290_v23 = vpop.eup %5289  ;;  %v4294_v29 = vadd.f32 1.0, %v5288_v55 }
 0x529   : > { %5293 = vrcp.f32 %v4281_v13  ;;  %v4091_v12 = vadd.f32 %v4090_v51, %v4007_v41  ;;  %v4295_v27 = vadd.f32 1.0, %v5290_v23 }
 0x52a   : > { %5295 = vrcp.f32 %v4294_v29 }
 0x52b   : > { %5297 = vrcp.f32 %v4295_v27 }
 0x52c   : > { %v5144_v37 = vpop.f32.mrf.mxu0 }
 0x52d   : > { %v4188_v46 = vadd.f32 %v5144_v37, %v4099_v16 }
 0x52e   : > { %v4181_v5 = vpop.f32.mrf.mxu0  ;;  %v5155_v14 = vpop.f32.mrf.mxu1 }
 0x52f   : > { %v4182_v15 = vadd.f32 %v4181_v5, %v4091_v12  ;;  %v4269_v1 = vadd.f32 %v5155_v14, %v4188_v46 }
 0x530   : > { %v4262_v19 = vpop.f32.mrf.mxu1 }
 0x531   : > { %v4263_v21 = vadd.f32 %v4262_v19, %v4182_v15 }
 0x532   : > { %v5292_v31 = vpop.eup %5291 }
 0x533   : > { %v4300_v54 = vmul.f32 %v5292_v31, %v4263_v21 }
 0x535   : > { %v4302_v35 = vadd.f32 %v4300_v54, %v3114_v26 }
 0x536   : > { %v5294_v30 = vpop.eup %5293 }
 0x537   : > { %v4301_v52 = vmul.f32 %v5294_v30, %v4269_v1  ;;  %5299 = vtanh.f32 %v4302_v35  ;;  %v5296_v42 = vpop.eup %5295 }
 0x538   : > { %v5298_v50 = vpop.eup %5297  ;;  %v4317_v57 = vsub.f32 1.0, %v5296_v42  ;;  %v4321_v7 = vmul.f32 %v5296_v42, %v4315_v6 }
 0x539   : > { %v4303_v2 = vadd.f32 %v4301_v52, %v3120_v3  ;;  %v4318_v43 = vsub.f32 1.0, %v5298_v50  ;;  %v4322_v61 = vmul.f32 %v5298_v50, %v4316_v39 }
 0x53b   : > { %5301 = vtanh.f32 %v4303_v2 }
 0x544   : > { %v5300_v20 = vpop.eup %5299 }
 0x545   : > { %v4319_v28 = vmul.f32 %v5300_v20, %v4317_v57 }
 0x547   : > { %v4323_v9 = vadd.f32 %v4321_v7, %v4319_v28  ;;  %4342 = sbr.rel (%p4568_p11) target bundleno = 1357 (0x54d), region = 88 }
 0x548   : > { %v5302_v53 = vpop.eup %5301 }
 0x549   : > { %v4320_v18 = vmul.f32 %v5302_v53, %v4318_v43 }
 0x54b   : > { %v4324_v8 = vadd.f32 %v4322_v61, %v4320_v18 }
 0x54c   : > { %4347 = vst.msk [vmem:[%s4346_s13] sm:$0xff] %vm903_vm3, %v4323_v9 }
 0x54d PF: > { %s4348_s22 = sadd.s32 1, %s7038_s23 }
 0x54e   : > { %s4349_s20 = sld [smem:[#allocation4 + %s4348_s22]] }
 0x554   : > { %p4571_p3 = scmp.lt.s32.totalorder %s4349_s20, 0 }
 0x555   : > { %s5547_s2 = smov (!%p4571_p3), 96   ;;  %s4572_s26 = sshll.u32 (!%p4571_p3), %s7472_s28, 1 }
 0x556   : > { %4353 = sbr.rel (%p4571_p3) target bundleno = 1487 (0x5cf), region = 92  ;;  %s4355_s24 = sadd.s32 (!%p4571_p3), %s4572_s26, %s4349_s20 }
 0x557   : > { %s4573_s14 = sshll.u32 (!%p4571_p3), %s4355_s24, 3 }
 0x558   : > { %s4361_s29 = scalar_lea.vmem (!%p4571_p3), [#allocation2], %s4573_s14 }
 0x55b   : > { %4357 = vrot.lane.b32.xlu0 %v4323_v9, %s5547_s2 }
 0x5cd   : > { %v4358_v11 = vpop.permute.xlu0 %4357 }
 0x5ce   : > { %4362 = vst.msk [vmem:[%s4361_s29] sm:$0xff] %vm903_vm3, %v4358_v11 }
 0x5cf PF: > { %s4589_s12 = sadd.s32 2, %s7038_s23 }
 0x5d0   : > { %s4366_s11 = sld [smem:[#allocation4 + %s4589_s12]] }
 0x5d6   : > { %p4576_p5 = scmp.lt.s32.totalorder %s4366_s11, 0 }
 0x5d7   : > { %s4577_s15 = sshll.u32 (!%p4576_p5), %s7472_s28, 1 }
 0x5d8   : > { %4370 = sbr.rel (%p4576_p5) target bundleno = 1502 (0x5de), region = 96  ;;  %s4372_s30 = sadd.s32 (!%p4576_p5), %s4577_s15, %s4366_s11 }
 0x5d9   : > { %s4578_s13 = sshll.u32 (!%p4576_p5), %s4372_s30, 3 }
 0x5da   : > { %s4374_s22 = scalar_lea.vmem (!%p4576_p5), [#allocation2], %s4578_s13 }
 0x5dd   : > { %4375 = vst.msk [vmem:[%s4374_s22] sm:$0xff] %vm903_vm3, %v4324_v8 }
 0x5de PF: > { %s4376_s20 = sadd.s32 1, %s4589_s12 }
 0x5df   : > { %s4377_s2 = sld [smem:[#allocation4 + %s4376_s20]] }
 0x5e5   : > { %p4579_p6 = scmp.lt.s32.totalorder %s4377_s2, 0 }
 0x5e6   : > { %s5548_s26 = smov (!%p4579_p6), 96   ;;  %s4580_s29 = sshll.u32 (!%p4579_p6), %s7472_s28, 1 }
 0x5e7   : > { %4381 = sbr.rel (%p4579_p6) target bundleno = 1632 (0x660), region = 100  ;;  %s4383_s23 = sadd.s32 (!%p4579_p6), %s4580_s29, %s4377_s2 }
 0x5e8   : > { %s4581_s24 = sshll.u32 (!%p4579_p6), %s4383_s23, 3 }
 0x5e9   : > { %s4389_s14 = scalar_lea.vmem (!%p4579_p6), [#allocation2], %s4581_s24 }
 0x5ec   : > { %4385 = vrot.lane.b32.xlu0 %v4324_v8, %s5548_s26 }
 0x65e   : > { %v4386_v47 = vpop.permute.xlu0 %4385 }
 0x65f   : > { %4390 = vst.msk [vmem:[%s4389_s14] sm:$0xff] %vm903_vm3, %v4386_v47 }
 0x660 PF: > { %s4590_s12 = sshll.u32 %s5523_s19, 8  ;;  %s4406_s13 = sshll.u32 %s5745_s0, 4  ;;  %s7171_s13 = int_to_ptr.vmem [resolvable:$true] %s4406_s13 }
 0x661   : > { %s7168_s30 = scalar_lea.hbm %s7230_s10, %s4590_s12  ;;  %s7453_s28 = sand.u32 1, %s5515_s17  }
 0x662   : > { %s7175_s22 = scalar_lea.sflag [#allocation7], %s7453_s28  ;;  %s5441_s20 = scalar_lea.vmem %s7171_s13, 256 }
 0x663   : > { %p5442_p7 = scmp.ne.s32.totalorder %s7171_s13, %s5441_s20  ;;  %p7454_p9 = scmp.ne.s32.totalorder %s7332_s25, 0 }
 0x664   : > { %s5549_s19 = smov [#allocation14]  }
 0x665   : > { %p5443_p12 = pnand %p5442_p7, %p7454_p9  ;;  %s5445_s2 = sshll.u32 %s5549_s19, 4  ;;  %s5446_s2 = int_to_ptr.vmem [resolvable:$false] %s5445_s2 }
 0x666   : > { %s5447_s26 = scalar_lea.vmem %s5446_s2, 512  ;;  %p5448_p13 = scmp.lt.s32.totalorder %s7171_s13, %s5446_s2 }
 0x667   : > { %p5444_p0 = pneg %p5443_p12  ;;  %p5449_p1 = scmp.lt.s32.totalorder %s5447_s26, %s5441_s20 }
 0x669   : > { %p5450_p2 = por %p5449_p1, %p5448_p13 }
 0x66b   : > { %p5451_p4 = pnand %p5450_p2, %p5444_p0 }
 0x66d   : > { %5454 = shalt.err (!%p5451_p4)
}
 0x66e   : > { %s5455_s0 = scalar_lea.hbm %s7168_s30, 256  ;;  %s5459_s24 = scalar_lea.hbm %s7230_s10, 768 }
 0x66f   : > { %p5456_p8 = scmp.ne.s32.totalorder %s7168_s30, %s5455_s0  ;;  %p5460_p3 = scmp.lt.s32.totalorder %s7168_s30, %s7230_s10 }
 0x670   : > { %p5461_p5 = scmp.lt.s32.totalorder %s5459_s24, %s5455_s0 }
 0x671   : > { %p5457_p10 = pnand %p5456_p8, %p7454_p9 }
 0x672   : > { %p5462_p6 = por %p5461_p5, %p5460_p3 }
 0x673   : > { %p5458_p11 = pneg %p5457_p10 }
 0x675   : > { %p5463_p7 = pnand %p5462_p6, %p5458_p11 }
 0x677   : > { %5466 = shalt.err (!%p5463_p7)
}
 0x678   : > { %s5550_s11 = smov 128   ;;  %s5551_s15 = smov 8  }
 0x679   : > { %5176 = dma.vmem_to_hbm [thread:$0]  (%p7454_p9), %s7171_s13, 256, %s7168_s30, %s7175_s22, %s5550_s11, %s5550_s11, %s5551_s15  }
 0x67a PF: > { %p5208_p12 = scmp.ge.s32.totalorder %s5531_s21, 2  ;;  %s4421_s28 = sand.u32 1, %s5511_s16  }
 0x67b   : > { %p7455_p0 = scmp.ne.s32.totalorder %s7333_s27, 0  ;;  %s4422_s20 = scalar_lea.sflag [#allocation7], %s4421_s28 }
 0x67d   : > { %p5195_p13 = pnand %p5208_p12, %p7455_p0 }
 0x67f   : > { %p5196_p1 = pneg %p5195_p13 }
 0x681   : > { %5506 = dma.done.wait (%p5196_p1), %s4422_s20, 256  }
 0x682   : > { %5508 = vsyncadd (%p5196_p1), %s4422_s20, 4294967040  ;;  %s30_s21 = sadd.s32 1, %s5531_s21   ;;  %s7456_s19 = sld [smem:[#allocation22_spill]] }
 0x683   : > { %p27_p2 = scmp.ge.s32.totalorder %s30_s21, 5   ;;  %s7457_s25 = sld [smem:[#allocation20_spill]] }
 0x684   : > { %s7458_s20 = sld [smem:[#allocation21_spill]]  ;;  %s7459_s16 = smov %s5515_s17 }
 0x685   : > { %s7460_s17 = smov %s5519_s18  ;;  %29 = sbr.rel (!%p27_p2) target bundleno = 13 (0xd), region = 139 }
 0x688   : > { %s7461_s18 = smov %s7456_s19 }
 0x689   : > { %s7462_s19 = smov %s7457_s25 }
 0x68a   :  { %4427 = vsyncpa [#allocation6], 1 }
 0x68b   :  { %4429 = vsyncpa [#allocation6 + $0x1], 1 }
 0x68c   :  { %4430 = vsyncpa [#allocation9], 1 }
 0x68d   :  { %4431 = vsyncpa [#allocation12], 1 }
 0x68e   :  { %4432 = vsyncpa [#allocation7], 1 }
 0x68f   :  { %4434 = vsyncpa [#allocation7 + $0x1], 1 }

</bundles_post_ra>
